<compile_context>
chip_gen: v6e
topology: v6e:2x2x1
jax: 0.10.0
libtpu: 0.0.40
codegen_flags: <defaults>
</compile_context>

<pallas_src>
import functools

import jax
import jax.numpy as jnp
from jax.experimental import pallas as pl
from jax.experimental.pallas import tpu as pltpu

K_IN = 28 * 28   # 784
H1 = 512
H2 = 256
N_CLS = 10
N_PAD = 128      # lane-dense padded class dim


def _round_up(n, m):
    return ((n + m - 1) // m) * m


@functools.lru_cache(maxsize=1)
def _bf16_activations_ok():
    """bf16 VPU/EUP exists on v6e/v7x; keep activations in f32 on v5e and older."""
    try:
        kind = jax.devices()[0].device_kind.lower()
    except Exception:
        return False
    return not any(v in kind for v in ("v2", "v3", "v4", "v5"))


def _choose_tiling(batch):
    """Pick (TB, B_pad). TB is a multiple of 16; batches > 16 rows split into
    >= 2 tiles (both v7x TensorCores get work); large batches minimize pad waste."""
    b16 = _round_up(max(batch, 1), 16)
    if b16 <= 16:
        return b16, b16                       # tiny batch: single 16-row tile
    if b16 <= 512:
        tb = _round_up(b16, 32) // 2          # exactly two tiles, multiple of 16
        return tb, 2 * tb
    best_tb, best_pad = None, None
    for tb in (512, 256, 128):                # prefer larger tiles on ties
        bp = _round_up(b16, tb)
        if best_pad is None or bp < best_pad:
            best_tb, best_pad = tb, bp
    return best_tb, best_pad


def _mlp_kernel(x_ref, w1_ref, b1_ref, w2_ref, b2_ref, w3_ref, b3_ref, o_ref,
                *, act_dtype):
    # fc1: f32 x tile cast to bf16 in-kernel (no wrapper pad/cast roundtrip);
    # bf16 x bf16 MXU matmul with f32 accumulation.
    x = x_ref[...].astype(jnp.bfloat16)
    h1 = jnp.dot(x, w1_ref[...], preferred_element_type=jnp.float32)
    h1 = jax.nn.sigmoid((h1 + b1_ref[...]).astype(act_dtype))
    # fc2
    h2 = jnp.dot(h1.astype(jnp.bfloat16), w2_ref[...],
                 preferred_element_type=jnp.float32)
    h2 = jax.nn.sigmoid((h2 + b2_ref[...]).astype(act_dtype))
    # fc3 over the padded (128-wide) class dim
    logits = jnp.dot(h2.astype(jnp.bfloat16), w3_ref[...],
                     preferred_element_type=jnp.float32)
    logits = logits + b3_ref[...]       # pad columns carry a finite -1e30 bias
    # log_softmax over classes in f32; pad columns contribute exp(-huge) = 0.
    m = jnp.max(logits, axis=-1, keepdims=True)
    lse = m + jnp.log(jnp.sum(jnp.exp(logits - m), axis=-1, keepdims=True))
    o_ref[...] = logits - lse


def prepare_params(params):
    """One-time conversion of raw (in, out) f32 params into kernel operands.

    Call once (e.g. at model load) and reuse across forward calls: this hoists
    all the pad + f32->bf16 cast HBM traffic out of the per-call path.
    """
    w1, b1, w2, b2, w3, b3 = params
    w1p = w1.astype(jnp.bfloat16)                                      # (784, 512)
    w2p = w2.astype(jnp.bfloat16)                                      # (512, 256)
    w3p = jnp.pad(w3.astype(jnp.float32),
                  ((0, 0), (0, N_PAD - N_CLS))).astype(jnp.bfloat16)   # (256, 128)
    b1r = b1.reshape(1, -1).astype(jnp.float32)
    b2r = b2.reshape(1, -1).astype(jnp.float32)
    # Finite -1e30 sentinel (NOT -inf): padded w3 columns are exactly zero, so pad
    # logits stay finite and vanish from the log-softmax without NaNs.
    b3r = jnp.pad(b3.reshape(1, -1).astype(jnp.float32),
                  ((0, 0), (0, N_PAD - N_CLS)), constant_values=-1e30)
    return jax.block_until_ready((w1p, b1r, w2p, b2r, w3p, b3r))


def mnist_mlp_forward(x, prepared_params):
    """x: (B, 1, 28, 28) or (B, 784), float. Returns (B, 10) log-probs.
    `prepared_params` must come from prepare_params()."""
    w1p, b1r, w2p, b2r, w3p, b3r = prepared_params
    x2d = x.reshape(-1, K_IN).astype(jnp.float32)
    batch = x2d.shape[0]

    tb, b_pad = _choose_tiling(batch)
    if b_pad != batch:
        x2d = jnp.pad(x2d, ((0, b_pad - batch), (0, 0)))

    act_dtype = jnp.bfloat16 if _bf16_activations_ok() else jnp.float32
    kernel = functools.partial(_mlp_kernel, act_dtype=act_dtype)

    cost = pl.CostEstimate(
        flops=2 * b_pad * (K_IN * H1 + H1 * H2 + H2 * N_PAD),
        transcendentals=b_pad * (H1 + H2 + N_PAD),
        bytes_accessed=(b_pad * K_IN * 4                        # x (f32, read once)
                        + (w1p.size + w2p.size + w3p.size) * 2  # bf16 weights
                        + (H1 + H2 + N_PAD) * 4                 # f32 biases
                        + b_pad * N_PAD * 4),                   # f32 output
    )

    out = pl.pallas_call(
        kernel,
        out_shape=jax.ShapeDtypeStruct((b_pad, N_PAD), jnp.float32),
        grid=(b_pad // tb,),
        in_specs=[
            pl.BlockSpec((tb, K_IN),  lambda i: (i, 0)),   # x tile (batch-indexed)
            pl.BlockSpec((K_IN, H1),  lambda i: (0, 0)),   # weights/biases: constant
            pl.BlockSpec((1, H1),     lambda i: (0, 0)),   #  maps -> VMEM-resident,
            pl.BlockSpec((H1, H2),    lambda i: (0, 0)),   #  no re-DMA per tile
            pl.BlockSpec((1, H2),     lambda i: (0, 0)),
            pl.BlockSpec((H2, N_PAD), lambda i: (0, 0)),
            pl.BlockSpec((1, N_PAD),  lambda i: (0, 0)),
        ],
        out_specs=pl.BlockSpec((tb, N_PAD), lambda i: (i, 0)),
        compiler_params=pltpu.CompilerParams(
            dimension_semantics=("parallel",),   # batch tiles shard across TCs
        ),
        cost_estimate=cost,
    )(x2d, w1p, b1r, w2p, b2r, w3p, b3r)

    return out[:batch, :N_CLS]


def init_params(key):
    """Deterministic init matching nn.Linear shapes (weights stored as (in, out))."""
    k1, k2, k3, k4, k5, k6 = jax.random.split(key, 6)

    def linear(kw, kb, fan_in, fan_out):
        bound = 1.0 / jnp.sqrt(fan_in)
        w = jax.random.uniform(kw, (fan_in, fan_out), jnp.float32, -bound, bound)
        b = jax.random.uniform(kb, (fan_out,), jnp.float32, -bound, bound)
        return w, b

    w1, b1 = linear(k1, k2, K_IN, H1)
    w2, b2 = linear(k3, k4, H1, H2)
    w3, b3 = linear(k5, k6, H2, N_CLS)
    return (w1, b1, w2, b2, w3, b3)


def _reference_forward(x, params):
    """Pure-JAX f32 reference for a loose correctness check."""
    w1, b1, w2, b2, w3, b3 = params
    h = x.reshape(-1, K_IN).astype(jnp.float32)
    h = jax.nn.sigmoid(h @ w1 + b1)
    h = jax.nn.sigmoid(h @ w2 + b2)
    logits = h @ w3 + b3
    return jax.nn.log_softmax(logits, axis=-1)


if __name__ == "__main__":
    key = jax.random.PRNGKey(0)
    kx, kp = jax.random.split(key)
    # Small MNIST-like batch: (B=2, C=1, H=28, W=28) NCHW.
    x = jax.random.normal(kx, (2, 1, 28, 28), dtype=jnp.float32)
    params = init_params(kp)
    prepped = prepare_params(params)   # one-time: all pads/bf16 casts hoisted here

    out = mnist_mlp_forward(x, prepped)
    out = jax.block_until_ready(out)

    assert out.shape == (2, 10)
    # log_softmax rows must (numerically) sum to 1 in prob space.
    assert jnp.allclose(jnp.sum(jnp.exp(out), axis=1), 1.0, atol=1e-4)
    # Loose agreement with an f32 reference (weights/activations are bf16 in-kernel).
    ref = _reference_forward(x, params)
    err = float(jnp.max(jnp.abs(out - ref)))
    assert err < 1.5e-1, err
    print("KERNEL_OK")
</pallas_src>

<mosaic_0001>
module attributes {stable_mosaic.version = 11 : i64} {
  func.func @_mlp_kernel(%arg0: i32, %arg1: memref<16x784xf32, #tpu.memory_space<vmem>>, %arg2: memref<784x512xbf16, #tpu.memory_space<vmem>>, %arg3: memref<1x512xf32, #tpu.memory_space<vmem>>, %arg4: memref<512x256xbf16, #tpu.memory_space<vmem>>, %arg5: memref<1x256xf32, #tpu.memory_space<vmem>>, %arg6: memref<256x128xbf16, #tpu.memory_space<vmem>>, %arg7: memref<1x128xf32, #tpu.memory_space<vmem>>, %arg8: memref<16x128xf32, #tpu.memory_space<vmem>>) attributes {dimension_semantics = [#tpu.dimension_semantics<parallel>], iteration_bounds = array<i64: 1>, scalar_prefetch = 0 : i64, scratch_operands = 0 : i64, tpu.core_type = #tpu.core_type<tc>, window_params = [{transform_indices = @transform_0, window_bounds = array<i64: 16, 784>}, {pipeline_mode = #tpu.pipeline_mode<synchronous>, transform_indices = @transform_1, window_bounds = array<i64: 784, 512>}, {pipeline_mode = #tpu.pipeline_mode<synchronous>, transform_indices = @transform_2, window_bounds = array<i64: 1, 512>}, {pipeline_mode = #tpu.pipeline_mode<synchronous>, transform_indices = @transform_3, window_bounds = array<i64: 512, 256>}, {pipeline_mode = #tpu.pipeline_mode<synchronous>, transform_indices = @transform_4, window_bounds = array<i64: 1, 256>}, {pipeline_mode = #tpu.pipeline_mode<synchronous>, transform_indices = @transform_5, window_bounds = array<i64: 256, 128>}, {pipeline_mode = #tpu.pipeline_mode<synchronous>, transform_indices = @transform_6, window_bounds = array<i64: 1, 128>}, {transform_indices = @transform_7, window_bounds = array<i64: 16, 128>}]} {
    %c0 = arith.constant 0 : index
    %c0_0 = arith.constant 0 : index
    %0 = vector.load %arg1[%c0, %c0_0] : memref<16x784xf32, #tpu.memory_space<vmem>>, vector<16x784xf32>
    %1 = arith.truncf %0 : vector<16x784xf32> to vector<16x784xbf16>
    %c0_1 = arith.constant 0 : index
    %c0_2 = arith.constant 0 : index
    %2 = vector.load %arg2[%c0_1, %c0_2] : memref<784x512xbf16, #tpu.memory_space<vmem>>, vector<784x512xbf16>
    %cst = arith.constant dense<0.000000e+00> : vector<16x512xf32>
    %3 = tpu.matmul %1, %2, %cst {dimension_numbers = #tpu.dot_dimension_numbers<[1], [0], [0], [1], [0, 0, 1, 1], [], []>} : vector<16x784xbf16>, vector<784x512xbf16>, vector<16x512xf32> -> vector<16x512xf32>
    %c0_3 = arith.constant 0 : index
    %c0_4 = arith.constant 0 : index
    %4 = vector.load %arg3[%c0_3, %c0_4] : memref<1x512xf32, #tpu.memory_space<vmem>>, vector<1x512xf32>
    %5 = vector.broadcast %4 : vector<1x512xf32> to vector<16x512xf32>
    %6 = arith.addf %3, %5 : vector<16x512xf32>
    %7 = arith.truncf %6 : vector<16x512xf32> to vector<16x512xbf16>
    %8 = arith.negf %7 : vector<16x512xbf16>
    %9 = math.exp %8 : vector<16x512xbf16>
    %cst_5 = arith.constant 1.000000e+00 : bf16
    %10 = vector.broadcast %cst_5 : bf16 to vector<16x512xbf16>
    %11 = arith.addf %10, %9 : vector<16x512xbf16>
    %12 = arith.divf %10, %11 : vector<16x512xbf16>
    %c0_6 = arith.constant 0 : index
    %c0_7 = arith.constant 0 : index
    %13 = vector.load %arg4[%c0_6, %c0_7] : memref<512x256xbf16, #tpu.memory_space<vmem>>, vector<512x256xbf16>
    %cst_8 = arith.constant dense<0.000000e+00> : vector<16x256xf32>
    %14 = tpu.matmul %12, %13, %cst_8 {dimension_numbers = #tpu.dot_dimension_numbers<[1], [0], [0], [1], [0, 0, 1, 1], [], []>} : vector<16x512xbf16>, vector<512x256xbf16>, vector<16x256xf32> -> vector<16x256xf32>
    %c0_9 = arith.constant 0 : index
    %c0_10 = arith.constant 0 : index
    %15 = vector.load %arg5[%c0_9, %c0_10] : memref<1x256xf32, #tpu.memory_space<vmem>>, vector<1x256xf32>
    %16 = vector.broadcast %15 : vector<1x256xf32> to vector<16x256xf32>
    %17 = arith.addf %14, %16 : vector<16x256xf32>
    %18 = arith.truncf %17 : vector<16x256xf32> to vector<16x256xbf16>
    %19 = arith.negf %18 : vector<16x256xbf16>
    %20 = math.exp %19 : vector<16x256xbf16>
    %cst_11 = arith.constant 1.000000e+00 : bf16
    %21 = vector.broadcast %cst_11 : bf16 to vector<16x256xbf16>
    %22 = arith.addf %21, %20 : vector<16x256xbf16>
    %23 = arith.divf %21, %22 : vector<16x256xbf16>
    %c0_12 = arith.constant 0 : index
    %c0_13 = arith.constant 0 : index
    %24 = vector.load %arg6[%c0_12, %c0_13] : memref<256x128xbf16, #tpu.memory_space<vmem>>, vector<256x128xbf16>
    %cst_14 = arith.constant dense<0.000000e+00> : vector<16x128xf32>
    %25 = tpu.matmul %23, %24, %cst_14 {dimension_numbers = #tpu.dot_dimension_numbers<[1], [0], [0], [1], [0, 0, 1, 1], [], []>} : vector<16x256xbf16>, vector<256x128xbf16>, vector<16x128xf32> -> vector<16x128xf32>
    %c0_15 = arith.constant 0 : index
    %c0_16 = arith.constant 0 : index
    %26 = vector.load %arg7[%c0_15, %c0_16] : memref<1x128xf32, #tpu.memory_space<vmem>>, vector<1x128xf32>
    %27 = vector.broadcast %26 : vector<1x128xf32> to vector<16x128xf32>
    %28 = arith.addf %25, %27 : vector<16x128xf32>
    %cst_17 = arith.constant dense<0xFF800000> : vector<16xf32>
    %29 = vector.multi_reduction <maximumf>, %28, %cst_17 [1] : vector<16x128xf32> to vector<16xf32>
    %30 = vector.shape_cast %29 : vector<16xf32> to vector<16x1xf32>
    %31 = vector.broadcast %30 : vector<16x1xf32> to vector<16x128xf32>
    %32 = arith.subf %28, %31 : vector<16x128xf32>
    %33 = math.exp %32 : vector<16x128xf32>
    %cst_18 = arith.constant dense<0.000000e+00> : vector<16xf32>
    %34 = vector.multi_reduction <add>, %33, %cst_18 [1] : vector<16x128xf32> to vector<16xf32>
    %35 = vector.shape_cast %34 : vector<16xf32> to vector<16x1xf32>
    %36 = math.log %35 : vector<16x1xf32>
    %37 = arith.addf %30, %36 : vector<16x1xf32>
    %38 = vector.broadcast %37 : vector<16x1xf32> to vector<16x128xf32>
    %39 = arith.subf %28, %38 : vector<16x128xf32>
    %c0_19 = arith.constant 0 : index
    %c0_20 = arith.constant 0 : index
    %40 = vector.load %arg8[%c0_19, %c0_20] : memref<16x128xf32, #tpu.memory_space<vmem>>, vector<16x128xf32>
    tpu.vector_store %arg8[%c0_19, %c0_20], %39 {strides = array<i32>} : memref<16x128xf32, #tpu.memory_space<vmem>>, vector<16x128xf32>,
    return
  }
  func.func @transform_0(%arg0: i32) -> (i32, i32) {
    %c0_i32 = arith.constant 0 : i32
    %c0_i32_0 = arith.constant 0 : i32
    return %arg0, %c0_i32 : i32, i32
  }
  func.func @transform_1(%arg0: i32) -> (i32, i32) {
    %c0_i32 = arith.constant 0 : i32
    %c0_i32_0 = arith.constant 0 : i32
    %c0_i32_1 = arith.constant 0 : i32
    return %c0_i32, %c0_i32_0 : i32, i32
  }
  func.func @transform_2(%arg0: i32) -> (i32, i32) {
    %c0_i32 = arith.constant 0 : i32
    %c0_i32_0 = arith.constant 0 : i32
    %c0_i32_1 = arith.constant 0 : i32
    return %c0_i32, %c0_i32_0 : i32, i32
  }
  func.func @transform_3(%arg0: i32) -> (i32, i32) {
    %c0_i32 = arith.constant 0 : i32
    %c0_i32_0 = arith.constant 0 : i32
    %c0_i32_1 = arith.constant 0 : i32
    return %c0_i32, %c0_i32_0 : i32, i32
  }
  func.func @transform_4(%arg0: i32) -> (i32, i32) {
    %c0_i32 = arith.constant 0 : i32
    %c0_i32_0 = arith.constant 0 : i32
    %c0_i32_1 = arith.constant 0 : i32
    return %c0_i32, %c0_i32_0 : i32, i32
  }
  func.func @transform_5(%arg0: i32) -> (i32, i32) {
    %c0_i32 = arith.constant 0 : i32
    %c0_i32_0 = arith.constant 0 : i32
    %c0_i32_1 = arith.constant 0 : i32
    return %c0_i32, %c0_i32_0 : i32, i32
  }
  func.func @transform_6(%arg0: i32) -> (i32, i32) {
    %c0_i32 = arith.constant 0 : i32
    %c0_i32_0 = arith.constant 0 : i32
    %c0_i32_1 = arith.constant 0 : i32
    return %c0_i32, %c0_i32_0 : i32, i32
  }
  func.func @transform_7(%arg0: i32) -> (i32, i32) {
    %c0_i32 = arith.constant 0 : i32
    %c0_i32_0 = arith.constant 0 : i32
    return %arg0, %c0_i32 : i32, i32
  }
}

</mosaic_0001>

<bundles_post_ra>
// kernel: tpu_custom_call.1
= control target key start
LH: loop header
LB: loop body
LE: loop exit
PB: predicated region body
PF: predicated region fallthrough
CT: control target
= control target key end

     0   :  { %12 = vsyncpa [#allocation3], 0  ;;  %s3436_s0 = inlined_call_operand.hbm [shape: f32[16,784], index: 0, kind: input, shape index: {}]   ;;  %s3437_s1 = inlined_call_operand.hbm [shape: bf16[784,512], index: 1, kind: input, shape index: {}]   ;;  %s3438_s2 = inlined_call_operand.hbm [shape: f32[1,512], index: 2, kind: input, shape index: {}]   ;;  %s3439_s3 = inlined_call_operand.hbm [shape: bf16[512,256], index: 3, kind: input, shape index: {}]   ;;  %s3440_s4 = inlined_call_operand.vmem [shape: f32[1,256], index: 4, kind: input, shape index: {}]   ;;  %s3441_s5 = inlined_call_operand.hbm [shape: bf16[256,128], index: 5, kind: input, shape index: {}]   ;;  %s3442_s6 = inlined_call_operand.vmem [shape: f32[1,128], index: 6, kind: input, shape index: {}]   ;;  %s3443_s7 = inlined_call_operand.hbm [shape: f32[16,128], index: 7, kind: output, shape index: {}]  }
   0x1   :  { %13 = vsyncpa [#allocation6], 0 }
   0x2   :  { %14 = vsyncpa [#allocation9], 0 }
   0x3   :  { %15 = vsyncpa [#allocation4], 0  ;;  %s3299_s24 = smov [#allocation5]  }
   0x4   :  { %s33_s25 = sshll.u32 %s3299_s24, 4  ;;  %s34_s25 = int_to_ptr.vmem [resolvable:$true] %s33_s25 }
   0x5   :  { %s3179_s26 = scalar_lea.vmem %s34_s25, 25088  ;;  %p3184_p1 = scmp.lt.s32.totalorder %s34_s25, %s34_s25 }
   0x6   :  { %p3180_p0 = scmp.ne.s32.totalorder %s34_s25, %s3179_s26  ;;  %p3185_p2 = scmp.lt.s32.totalorder %s3179_s26, %s3179_s26 }
   0x8   :  { %p3186_p3 = por %p3185_p2, %p3184_p1 }
   0xa   :  { %p3187_p4 = pnand %p3186_p3, %p3180_p0 }
   0xc   :  { %3190 = shalt.err (!%p3187_p4)
}
   0xd   :  { %s3300_s27 = smov 256   ;;  %s3301_s28 = smov 16  }
   0xe   :  { %39 = dma.hbm_to_vmem [thread:$0]  %s3437_s1, 25088, %s34_s25, [#allocation6], %s3300_s27, %s3300_s27, %s3301_s28  }
   0xf   :  { %s3302_s8 = smov [#allocation8]  }
  0x10   :  { %s55_s9 = sshll.u32 %s3302_s8, 4  ;;  %s56_s9 = int_to_ptr.vmem [resolvable:$true] %s55_s9 }
  0x11   :  { %s3199_s10 = scalar_lea.vmem %s56_s9, 8192  ;;  %p3204_p6 = scmp.lt.s32.totalorder %s56_s9, %s56_s9 }
  0x12   :  { %p3200_p5 = scmp.ne.s32.totalorder %s56_s9, %s3199_s10  ;;  %p3205_p7 = scmp.lt.s32.totalorder %s3199_s10, %s3199_s10 }
  0x14   :  { %p3206_p8 = por %p3205_p7, %p3204_p6 }
  0x16   :  { %p3207_p9 = pnand %p3206_p8, %p3200_p5 }
  0x18   :  { %3210 = shalt.err (!%p3207_p9)
}
  0x19   :  { %s3303_s11 = smov 128   ;;  %s3304_s12 = smov 8  }
  0x1a   :  { %61 = dma.hbm_to_vmem [thread:$0]  %s3439_s3, 8192, %s56_s9, [#allocation9], %s3303_s11, %s3303_s11, %s3304_s12  }
  0x1b   :  { %s3305_s1 = smov [#allocation2]  }
  0x1c   :  { %s21_s15 = sshll.u32 %s3305_s1, 4  ;;  %s22_s15 = int_to_ptr.vmem [resolvable:$true] %s21_s15 }
  0x1d   :  { %s3219_s16 = scalar_lea.vmem %s22_s15, 1792  ;;  %p3224_p11 = scmp.lt.s32.totalorder %s22_s15, %s22_s15 }
  0x1e   :  { %p3220_p10 = scmp.ne.s32.totalorder %s22_s15, %s3219_s16  ;;  %p3225_p12 = scmp.lt.s32.totalorder %s3219_s16, %s3219_s16 }
  0x20   :  { %p3226_p13 = por %p3225_p12, %p3224_p11 }
  0x22   :  { %p3227_p0 = pnand %p3226_p13, %p3220_p10 }
  0x24   :  { %3230 = shalt.err (!%p3227_p0)
}
  0x25   :  { %s3306_s17 = smov 896   ;;  %s3307_s18 = smov 56  }
  0x26   :  { %27 = dma.hbm_to_vmem [thread:$0]  %s3436_s0, 1792, %s22_s15, [#allocation3], %s3306_s17, %s3306_s17, %s3307_s18  }
  0x27   :  { %s3308_s21 = smov [#allocation7]   ;;  %s3309_s3 = smov [#allocation10]  }
  0x28   :  { %s46_s22 = sshll.u32 %s3308_s21, 4  ;;  %s69_s23 = sshll.u32 %s3309_s3, 4  ;;  %s47_s22 = int_to_ptr.vmem [resolvable:$true] %s46_s22  ;;  %s70_s23 = int_to_ptr.vmem [resolvable:$true] %s69_s23 }
  0x29   :  { %s3239_s24 = scalar_lea.vmem %s47_s22, 64  ;;  %p3244_p2 = scmp.lt.s32.totalorder %s47_s22, %s47_s22 }
  0x2a   :  { %p3240_p1 = scmp.ne.s32.totalorder %s47_s22, %s3239_s24  ;;  %p3245_p3 = scmp.lt.s32.totalorder %s3239_s24, %s3239_s24 }
  0x2c   :  { %p3246_p4 = por %p3245_p3, %p3244_p2 }
  0x2e   :  { %p3247_p5 = pnand %p3246_p4, %p3240_p1 }
  0x30   :  { %3250 = shalt.err (!%p3247_p5)
}
  0x31   :  { %49 = dma.hbm_to_vmem [thread:$0]  %s3438_s2, 64, %s47_s22, [#allocation6]  }
  0x32   :  { %s3259_s27 = scalar_lea.vmem %s70_s23, 2048  ;;  %p3264_p7 = scmp.lt.s32.totalorder %s70_s23, %s70_s23 }
  0x33   :  { %p3260_p6 = scmp.ne.s32.totalorder %s70_s23, %s3259_s27  ;;  %p3265_p8 = scmp.lt.s32.totalorder %s3259_s27, %s3259_s27 }
  0x35   :  { %p3266_p9 = por %p3265_p8, %p3264_p7 }
  0x37   :  { %p3267_p10 = pnand %p3266_p9, %p3260_p6 }
  0x39   :  { %3270 = shalt.err (!%p3267_p10)
}
  0x3a   :  { %s3310_s0 = smov 64   ;;  %s3311_s28 = smov 4  }
  0x3b   :  { %75 = dma.hbm_to_vmem [thread:$0]  %s3441_s5, 2048, %s70_s23, [#allocation9], %s3310_s0, %s3310_s0, %s3311_s28  }
  0x3c   :  { %3291 = dma.done.wait [#allocation3], 1792  }
  0x3d   :  { %3292 = vsyncadd [#allocation3], 4294965504 }
  0x3e   :  { %3293 = dma.done.wait [#allocation6], 25152  }
  0x3f   :  { %3294 = vsyncadd [#allocation6], 4294942144 }
  0x40   :  { %3295 = dma.done.wait [#allocation9], 10240  }
  0x41   :  { %3296 = vsyncadd [#allocation9], 4294957056  ;;  %v2733_v0 = vld [vmem:[#allocation5 + $0xe4] ss:$16 sps:$4 sm:$0xff]   ;;  %v2737_v2 = vld [vmem:[#allocation5 + $0xe0] ss:$16 sps:$4 sm:$0xff]  }
  0x42   :  { %v2735_v1 = vld [vmem:[#allocation5 + $0x2e4] ss:$16 sps:$4 sm:$0xff]   ;;  %1318 = vmatprep.subr.bf16.mxu0 %v2733_v0  ;;  %v2738_v3 = vld [vmem:[#allocation5 + $0x2e0] ss:$16 sps:$4 sm:$0xff]   ;;  %v96_v46 = vld [vmem:[#allocation2 + $0x8] sm:$0xff]  ;;  %vm1314_vm0 = vcmask 130048  }
  0x43   :  { %1361 = vmatprep.subr.bf16.mxu1 %v2735_v1  ;;  %v2739_v4 = vld [vmem:[#allocation5 + $0xc4] ss:$16 sps:$4 sm:$0xff]   ;;  %1319 = vmatpush1.bf16.msra.mxu0 %v2737_v2  ;;  %v2743_v6 = vld [vmem:[#allocation5 + $0xc0] ss:$16 sps:$4 sm:$0xff]   ;;  %v98_v48 = vld [vmem:[#allocation2 + $0x18] sm:$0xff] }
  0x44   :  { %1362 = vmatpush1.bf16.msra.mxu1 %v2738_v3  ;;  %v2741_v5 = vld [vmem:[#allocation5 + $0x2c4] ss:$16 sps:$4 sm:$0xff]   ;;  %1320 = vmatprep.subr.bf16.mxu0 %v2739_v4  ;;  %v2744_v7 = vld [vmem:[#allocation5 + $0x2c0] ss:$16 sps:$4 sm:$0xff]  }
  0x45   :  { %1363 = vmatprep.subr.bf16.mxu1 %v2741_v5  ;;  %v2745_v8 = vld [vmem:[#allocation5 + $0xa4] ss:$16 sps:$4 sm:$0xff]   ;;  %v2749_v10 = vld [vmem:[#allocation5 + $0xa0] ss:$16 sps:$4 sm:$0xff]  }
  0x46   :  { %v2747_v9 = vld [vmem:[#allocation5 + $0x2a4] ss:$16 sps:$4 sm:$0xff]   ;;  %v2750_v11 = vld [vmem:[#allocation5 + $0x2a0] ss:$16 sps:$4 sm:$0xff]  }
  0x47   :  { %1321 = vmatpush1.bf16.msra.mxu0 %v2743_v6  ;;  %v2751_v12 = vld [vmem:[#allocation5 + $0x84] ss:$16 sps:$4 sm:$0xff]   ;;  %v2755_v14 = vld [vmem:[#allocation5 + $0x80] ss:$16 sps:$4 sm:$0xff]  }
  0x48   :  { %1364 = vmatpush1.bf16.msra.mxu1 %v2744_v7  ;;  %1322 = vmatprep.subr.bf16.mxu0 %v2745_v8  ;;  %v2753_v13 = vld [vmem:[#allocation5 + $0x284] ss:$16 sps:$4 sm:$0xff]   ;;  %v2756_v15 = vld [vmem:[#allocation5 + $0x280] ss:$16 sps:$4 sm:$0xff]   ;;  %v102_v7 = vld [vmem:[#allocation2 + $0x38] sm:$0xff] }
  0x49   :  { %1365 = vmatprep.subr.bf16.mxu1 %v2747_v9  ;;  %v2757_v16 = vld [vmem:[#allocation5 + $0x64] ss:$16 sps:$4 sm:$0xff]   ;;  %v2761_v18 = vld [vmem:[#allocation5 + $0x60] ss:$16 sps:$4 sm:$0xff]   ;;  %v104_v9 = vld [vmem:[#allocation2 + $0x48] sm:$0xff] }
  0x4a   :  { %v2759_v17 = vld [vmem:[#allocation5 + $0x264] ss:$16 sps:$4 sm:$0xff]   ;;  %v2762_v19 = vld [vmem:[#allocation5 + $0x260] ss:$16 sps:$4 sm:$0xff]  }
  0x4b   :  { %1323 = vmatpush1.bf16.msra.mxu0 %v2749_v10  ;;  %v2763_v20 = vld [vmem:[#allocation5 + $0x44] ss:$16 sps:$4 sm:$0xff]   ;;  %v2767_v22 = vld [vmem:[#allocation5 + $0x40] ss:$16 sps:$4 sm:$0xff]  }
  0x4c   :  { %1366 = vmatpush1.bf16.msra.mxu1 %v2750_v11  ;;  %1324 = vmatprep.subr.bf16.mxu0 %v2751_v12  ;;  %v2765_v21 = vld [vmem:[#allocation5 + $0x244] ss:$16 sps:$4 sm:$0xff]   ;;  %v2768_v23 = vld [vmem:[#allocation5 + $0x240] ss:$16 sps:$4 sm:$0xff]  }
  0x4d   :  { %1367 = vmatprep.subr.bf16.mxu1 %v2753_v13  ;;  %v2769_v24 = vld [vmem:[#allocation5 + $0x24] ss:$16 sps:$4 sm:$0xff]   ;;  %v2773_v26 = vld [vmem:[#allocation5 + $0x20] ss:$16 sps:$4 sm:$0xff]  }
  0x4e   :  { %v2771_v25 = vld [vmem:[#allocation5 + $0x224] ss:$16 sps:$4 sm:$0xff]   ;;  %v2774_v27 = vld [vmem:[#allocation5 + $0x220] ss:$16 sps:$4 sm:$0xff]  }
  0x4f   :  { %1325 = vmatpush1.bf16.msra.mxu0 %v2755_v14  ;;  %v2775_v28 = vld [vmem:[#allocation5 + $0x4] ss:$16 sps:$4 sm:$0xff]   ;;  %v2779_v30 = vld [vmem:[#allocation5] ss:$16 sps:$4 sm:$0xff]  }
  0x50   :  { %1368 = vmatpush1.bf16.msra.mxu1 %v2756_v15  ;;  %1326 = vmatprep.subr.bf16.mxu0 %v2757_v16  ;;  %v2777_v29 = vld [vmem:[#allocation5 + $0x204] ss:$16 sps:$4 sm:$0xff]   ;;  %v2780_v31 = vld [vmem:[#allocation5 + $0x200] ss:$16 sps:$4 sm:$0xff]  }
  0x51   :  { %1369 = vmatprep.subr.bf16.mxu1 %v2759_v17  ;;  %v2781_v32 = vld [vmem:[#allocation5 + $0x1e4] ss:$16 sps:$4 sm:$0xff]   ;;  %v2785_v34 = vld [vmem:[#allocation5 + $0x1e0] ss:$16 sps:$4 sm:$0xff]   ;;  %v2840_v17 = vld [vmem:[#allocation5 + $0xec] ss:$16 sps:$4 sm:$0xff]  }
  0x52   :  { %v2783_v33 = vld [vmem:[#allocation5 + $0x3e4] ss:$16 sps:$4 sm:$0xff]   ;;  %v2786_v35 = vld [vmem:[#allocation5 + $0x3e0] ss:$16 sps:$4 sm:$0xff]  }
  0x53   :  { %1327 = vmatpush1.bf16.msra.mxu0 %v2761_v18  ;;  %v2787_v36 = vld [vmem:[#allocation5 + $0x1c4] ss:$16 sps:$4 sm:$0xff]   ;;  %v2791_v38 = vld [vmem:[#allocation5 + $0x1c0] ss:$16 sps:$4 sm:$0xff]  }
  0x54   :  { %1370 = vmatpush1.bf16.msra.mxu1 %v2762_v19  ;;  %1328 = vmatprep.subr.bf16.mxu0 %v2763_v20  ;;  %v2789_v37 = vld [vmem:[#allocation5 + $0x3c4] ss:$16 sps:$4 sm:$0xff]   ;;  %v2792_v39 = vld [vmem:[#allocation5 + $0x3c0] ss:$16 sps:$4 sm:$0xff]   ;;  %v108_v20 = vld [vmem:[#allocation2 + $0x68] sm:$0xff] }
  0x55   :  { %1371 = vmatprep.subr.bf16.mxu1 %v2765_v21  ;;  %v2793_v40 = vld [vmem:[#allocation5 + $0x1a4] ss:$16 sps:$4 sm:$0xff]   ;;  %v2797_v42 = vld [vmem:[#allocation5 + $0x1a0] ss:$16 sps:$4 sm:$0xff]   ;;  %v3312_v21 = vmov 0  }
  0x56   :  { %v2795_v41 = vld [vmem:[#allocation5 + $0x3a4] ss:$16 sps:$4 sm:$0xff]   ;;  %v2798_v43 = vld [vmem:[#allocation5 + $0x3a0] ss:$16 sps:$4 sm:$0xff]  }
  0x57   :  { %1329 = vmatpush1.bf16.msra.mxu0 %v2767_v22  ;;  %v2799_v44 = vld [vmem:[#allocation5 + $0x184] ss:$16 sps:$4 sm:$0xff]   ;;  %v2803_v50 = vld [vmem:[#allocation5 + $0x180] ss:$16 sps:$4 sm:$0xff]  }
  0x58   :  { %1372 = vmatpush1.bf16.msra.mxu1 %v2768_v23  ;;  %1330 = vmatprep.subr.bf16.mxu0 %v2769_v24  ;;  %v2801_v45 = vld [vmem:[#allocation5 + $0x384] ss:$16 sps:$4 sm:$0xff]   ;;  %v2804_v51 = vld [vmem:[#allocation5 + $0x380] ss:$16 sps:$4 sm:$0xff]   ;;  %v2838_v24 = vld [vmem:[#allocation5 + $0xe8] ss:$16 sps:$4 sm:$0xff]  }
  0x59   :  { %1373 = vmatprep.subr.bf16.mxu1 %v2771_v25  ;;  %v103_v47 = vld [vmem:[#allocation2 + $0x40] sm:$0xff]  ;;  %v105_v49 = vld [vmem:[#allocation2 + $0x50] sm:$0xff] }
  0x5a   :  { %v2805_v52 = vld [vmem:[#allocation5 + $0x164] ss:$16 sps:$4 sm:$0xff]   ;;  %v3372_v53 = vpack.c.bf16 %v103_v47, %v96_v46  ;;  %v3374_v54 = vpack.c.bf16 %v105_v49, %v98_v48  ;;  %v2809_v56 = vld [vmem:[#allocation5 + $0x160] ss:$16 sps:$4 sm:$0xff]   ;;  %v2868_v47 = vld [vmem:[#allocation5 + $0x48] ss:$16 sps:$4 sm:$0xff]  }
  0x5b   :  { %1331 = vmatpush1.bf16.msra.mxu0 %v2773_v26  ;;  %v2807_v55 = vld [vmem:[#allocation5 + $0x364] ss:$16 sps:$4 sm:$0xff]   ;;  %v2810_v57 = vld [vmem:[#allocation5 + $0x360] ss:$16 sps:$4 sm:$0xff]   ;;  %v2846_v26 = vld [vmem:[#allocation5 + $0xcc] ss:$16 sps:$4 sm:$0xff]  }
  0x5c   :  { %1374 = vmatpush1.bf16.msra.mxu1 %v2774_v27  ;;  %1332 = vmatprep.subr.bf16.mxu0 %v2775_v28  ;;  %v2811_v58 = vld [vmem:[#allocation5 + $0x144] ss:$16 sps:$4 sm:$0xff]   ;;  %v2815_v60 = vld [vmem:[#allocation5 + $0x140] ss:$16 sps:$4 sm:$0xff]   ;;  %v2844_v28 = vld [vmem:[#allocation5 + $0xc8] ss:$16 sps:$4 sm:$0xff]  }
  0x5d   :  { %1375 = vmatprep.subr.bf16.mxu1 %v2777_v29  ;;  %1350 = vmatprep.mubr.bf16.mxu0 %v3372_v53  ;;  %v2813_v59 = vld [vmem:[#allocation5 + $0x344] ss:$16 sps:$4 sm:$0xff]   ;;  %v2816_v61 = vld [vmem:[#allocation5 + $0x340] ss:$16 sps:$4 sm:$0xff]   ;;  %v2876_v49 = vld [vmem:[#allocation5 + $0x2c] ss:$16 sps:$4 sm:$0xff]  }
  0x5e   :  { %1393 = vmatprep.mubr.bf16.mxu1 %v3374_v54  ;;  %v2817_v62 = vld [vmem:[#allocation5 + $0x124] ss:$16 sps:$4 sm:$0xff]   ;;  %v2821_v0 = vld [vmem:[#allocation5 + $0x120] ss:$16 sps:$4 sm:$0xff]  }
  0x5f   :  { %1333 = vmatpush1.bf16.msra.mxu0 %v2779_v30  ;;  %v2819_v63 = vld [vmem:[#allocation5 + $0x324] ss:$16 sps:$4 sm:$0xff]   ;;  %v2822_v1 = vld [vmem:[#allocation5 + $0x320] ss:$16 sps:$4 sm:$0xff]   ;;  %v2852_v30 = vld [vmem:[#allocation5 + $0xac] ss:$16 sps:$4 sm:$0xff]  }
  0x60   :  { %1376 = vmatpush1.bf16.msra.mxu1 %v2780_v31  ;;  %1334 = vmatprep.subr.bf16.mxu0 %v2781_v32  ;;  %v2823_v2 = vld [vmem:[#allocation5 + $0x104] ss:$16 sps:$4 sm:$0xff]   ;;  %v2827_v4 = vld [vmem:[#allocation5 + $0x100] ss:$16 sps:$4 sm:$0xff]   ;;  %v2850_v32 = vld [vmem:[#allocation5 + $0xa8] ss:$16 sps:$4 sm:$0xff]  }
  0x61   :  { %1377 = vmatprep.subr.bf16.mxu1 %v2783_v33  ;;  %v2825_v3 = vld [vmem:[#allocation5 + $0x304] ss:$16 sps:$4 sm:$0xff]   ;;  %v2828_v5 = vld [vmem:[#allocation5 + $0x300] ss:$16 sps:$4 sm:$0xff]  }
  0x62   :  { %v95_v6 = vld [vmem:[#allocation2] sm:$0xff]  ;;  %v97_v8 = vld [vmem:[#allocation2 + $0x10] sm:$0xff] }
  0x63   :  { %1335 = vmatpush2.bf16.msra.mxu0 %v2785_v34  ;;  %v2831_v10 = vld [vmem:[#allocation5 + $0x4e4] ss:$16 sps:$4 sm:$0xff]   ;;  %v3378_v12 = vpack.c.bf16 %v102_v7, %v95_v6  ;;  %v3380_v13 = vpack.c.bf16 %v104_v9, %v97_v8  ;;  %v2829_v14 = vld [vmem:[#allocation5 + $0x4e0] ss:$16 sps:$4 sm:$0xff]   ;;  %v2858_v34 = vld [vmem:[#allocation5 + $0x8c] ss:$16 sps:$4 sm:$0xff]  }
  0x64   :  { %1378 = vmatpush2.bf16.msra.mxu1 %v2786_v35  ;;  %1336 = vmatprep.subr.bf16.mxu0 %v2787_v36  ;;  %v2834_v11 = vld [vmem:[#allocation5 + $0x604] ss:$16 sps:$4 sm:$0xff]   ;;  %v2832_v15 = vld [vmem:[#allocation5 + $0x600] ss:$16 sps:$4 sm:$0xff]   ;;  %v2856_v36 = vld [vmem:[#allocation5 + $0x88] ss:$16 sps:$4 sm:$0xff]  }
  0x65   :  { %1379 = vmatprep.subr.bf16.mxu1 %v2789_v37  ;;  %v2837_v16 = vld [vmem:[#allocation5 + $0x4c4] ss:$16 sps:$4 sm:$0xff]   ;;  %v2835_v18 = vld [vmem:[#allocation5 + $0x4c0] ss:$16 sps:$4 sm:$0xff]   ;;  %v2906_v6 = vld [vmem:[#allocation5 + $0x18c] ss:$16 sps:$4 sm:$0xff]  }
  0x66   :  { %v101_v19 = vld [vmem:[#allocation2 + $0x30] sm:$0xff]  ;;  %v2904_v8 = vld [vmem:[#allocation5 + $0x188] ss:$16 sps:$4 sm:$0xff]  }
  0x67   :  { %1337 = vmatpush2.bf16.msra.mxu0 %v2791_v38  ;;  %v2843_v22 = vld [vmem:[#allocation5 + $0x4a4] ss:$16 sps:$4 sm:$0xff]   ;;  %v3385_v23 = vpack.c.bf16 %v108_v20, %v101_v19  ;;  %v2841_v25 = vld [vmem:[#allocation5 + $0x4a0] ss:$16 sps:$4 sm:$0xff]   ;;  %v2864_v38 = vld [vmem:[#allocation5 + $0x6c] ss:$16 sps:$4 sm:$0xff]  }
  0x68   :  { %1380 = vmatpush2.bf16.msra.mxu1 %v2792_v39  ;;  %1338 = vmatprep.subr.bf16.mxu0 %v2793_v40  ;;  %v2849_v27 = vld [vmem:[#allocation5 + $0x484] ss:$16 sps:$4 sm:$0xff]   ;;  %v2847_v29 = vld [vmem:[#allocation5 + $0x480] ss:$16 sps:$4 sm:$0xff]   ;;  %v2862_v40 = vld [vmem:[#allocation5 + $0x68] ss:$16 sps:$4 sm:$0xff]  }
  0x69   :  { %1381 = vmatprep.subr.bf16.mxu1 %v2795_v41  ;;  %v2855_v31 = vld [vmem:[#allocation5 + $0x464] ss:$16 sps:$4 sm:$0xff]   ;;  %v2853_v33 = vld [vmem:[#allocation5 + $0x460] ss:$16 sps:$4 sm:$0xff]   ;;  %v100_v41 = vld [vmem:[#allocation2 + $0x28] sm:$0xff] }
  0x6a   :  { %v2861_v35 = vld [vmem:[#allocation5 + $0x444] ss:$16 sps:$4 sm:$0xff]   ;;  %v2859_v37 = vld [vmem:[#allocation5 + $0x440] ss:$16 sps:$4 sm:$0xff]  }
  0x6b   :  { %1339 = vmatpush2.bf16.msra.mxu0 %v2797_v42  ;;  %v2867_v39 = vld [vmem:[#allocation5 + $0x424] ss:$16 sps:$4 sm:$0xff]   ;;  %v2871_v48 = vld [vmem:[#allocation5 + $0x400] ss:$16 sps:$4 sm:$0xff]  }
  0x6c   :  { %1382 = vmatpush2.bf16.msra.mxu1 %v2798_v43  ;;  %1340 = vmatprep.subr.bf16.mxu0 %v2799_v44  ;;  %v107_v42 = vld [vmem:[#allocation2 + $0x60] sm:$0xff] }
  0x6d   :  { %1383 = vmatprep.subr.bf16.mxu1 %v2801_v45  ;;  %v2865_v43 = vld [vmem:[#allocation5 + $0x420] ss:$16 sps:$4 sm:$0xff]   ;;  %v3390_v44 = vpack.c.bf16 %v107_v42, %v100_v41  ;;  %v2870_v45 = vld [vmem:[#allocation5 + $0x4c] ss:$16 sps:$4 sm:$0xff]   ;;  %v2873_v46 = vld [vmem:[#allocation5 + $0x404] ss:$16 sps:$4 sm:$0xff]  }
  0x6e   :  { %v2909_v7 = vld [vmem:[#allocation5 + $0x544] ss:$16 sps:$4 sm:$0xff]   ;;  %v2907_v9 = vld [vmem:[#allocation5 + $0x540] ss:$16 sps:$4 sm:$0xff]   ;;  %v2948_v41 = vld [vmem:[#allocation5 + $0x4ac] ss:$16 sps:$4 sm:$0xff]  }
  0x6f   :  { %1341 = vmatpush2.bf16.msra.mxu0 %v2803_v50  ;;  %v2879_v50 = vld [vmem:[#allocation5 + $0x5e4] ss:$16 sps:$4 sm:$0xff]   ;;  %v2919_v19 = vld [vmem:[#allocation5 + $0x500] ss:$16 sps:$4 sm:$0xff]   ;;  %v2951_v42 = vld [vmem:[#allocation5 + $0x26c] ss:$16 sps:$4 sm:$0xff]  }
  0x70   :  { %1384 = vmatpush2.bf16.msra.mxu1 %v2804_v51  ;;  %1342 = vmatprep.subr.bf16.mxu0 %v2805_v52  ;;  %v2874_v51 = vld [vmem:[#allocation5 + $0x28] ss:$16 sps:$4 sm:$0xff]   ;;  %v2877_v52 = vld [vmem:[#allocation5 + $0x5e0] ss:$16 sps:$4 sm:$0xff]  }
  0x71   :  { %1385 = vmatprep.subr.bf16.mxu1 %v2807_v55  ;;  %v2885_v55 = vld [vmem:[#allocation5 + $0x5c4] ss:$16 sps:$4 sm:$0xff]  }
  0x72   :  { %v99_v20 = vld [vmem:[#allocation2 + $0x20] sm:$0xff] }
  0x73   :  { %1343 = vmatpush2.bf16.msra.mxu0 %v2809_v56  ;;  %v2880_v56 = vld [vmem:[#allocation5 + $0x8] ss:$16 sps:$4 sm:$0xff]  }
  0x74   :  { %1386 = vmatpush2.bf16.msra.mxu1 %v2810_v57  ;;  %1344 = vmatprep.subr.bf16.mxu0 %v2811_v58  ;;  %v2883_v57 = vld [vmem:[#allocation5 + $0x5c0] ss:$16 sps:$4 sm:$0xff]   ;;  %v2888_v58 = vld [vmem:[#allocation5 + $0x1ec] ss:$16 sps:$4 sm:$0xff]  }
  0x75   :  { %1387 = vmatprep.subr.bf16.mxu1 %v2813_v59  ;;  %v2891_v59 = vld [vmem:[#allocation5 + $0x5a4] ss:$16 sps:$4 sm:$0xff]  }
  0x77   :  { %1345 = vmatpush2.bf16.msra.mxu0 %v2815_v60  ;;  %v2886_v60 = vld [vmem:[#allocation5 + $0x1e8] ss:$16 sps:$4 sm:$0xff]  }
  0x78   :  { %1388 = vmatpush2.bf16.msra.mxu1 %v2816_v61  ;;  %1346 = vmatprep.subr.bf16.mxu0 %v2817_v62  ;;  %v2889_v61 = vld [vmem:[#allocation5 + $0x5a0] ss:$16 sps:$4 sm:$0xff]   ;;  %v2894_v62 = vld [vmem:[#allocation5 + $0x1cc] ss:$16 sps:$4 sm:$0xff]  }
  0x79   :  { %1389 = vmatprep.subr.bf16.mxu1 %v2819_v63  ;;  %v2897_v63 = vld [vmem:[#allocation5 + $0x584] ss:$16 sps:$4 sm:$0xff]  }
  0x7b   :  { %1347 = vmatpush2.bf16.msra.mxu0 %v2821_v0  ;;  %v2892_v0 = vld [vmem:[#allocation5 + $0x1c8] ss:$16 sps:$4 sm:$0xff]  }
  0x7c   :  { %1390 = vmatpush2.bf16.msra.mxu1 %v2822_v1  ;;  %1348 = vmatprep.subr.bf16.mxu0 %v2823_v2  ;;  %v2895_v1 = vld [vmem:[#allocation5 + $0x580] ss:$16 sps:$4 sm:$0xff]   ;;  %v2900_v2 = vld [vmem:[#allocation5 + $0x1ac] ss:$16 sps:$4 sm:$0xff]  }
  0x7d   :  { %1391 = vmatprep.subr.bf16.mxu1 %v2825_v3  ;;  %v2903_v3 = vld [vmem:[#allocation5 + $0x564] ss:$16 sps:$4 sm:$0xff]  }
  0x7f   :  { %1349 = vmatpush2.bf16.msra.mxu0 %v2827_v4  ;;  %v2898_v4 = vld [vmem:[#allocation5 + $0x1a8] ss:$16 sps:$4 sm:$0xff]  }
  0x80   :  { %1392 = vmatpush2.bf16.msra.mxu1 %v2828_v5  ;;  %1404 = vmatprep.subr.bf16.mxu0 %v2831_v10  ;;  %v2901_v5 = vld [vmem:[#allocation5 + $0x560] ss:$16 sps:$4 sm:$0xff]   ;;  %v2912_v10 = vld [vmem:[#allocation5 + $0x16c] ss:$16 sps:$4 sm:$0xff]  }
  0x81   :  { %1461 = vmatprep.subr.bf16.mxu1 %v2834_v11  ;;  %v2915_v11 = vld [vmem:[#allocation5 + $0x524] ss:$16 sps:$4 sm:$0xff]  }
  0x82   :  { %1351 = vmatmul.mubr.bf16.vlgmr.msra.gmra.mxu0 %v3378_v12 }
  0x83   :  { %1394 = vmatmul.mubr.bf16.vlgmr.msra.gmra.mxu1 %v3380_v13  ;;  %1405 = vmatpush1.bf16.msra.mxu0 %v2829_v14  ;;  %v2910_v14 = vld [vmem:[#allocation5 + $0x168] ss:$16 sps:$4 sm:$0xff]  }
  0x84   :  { %1462 = vmatpush1.bf16.msra.mxu1 %v2832_v15  ;;  %1406 = vmatprep.subr.bf16.mxu0 %v2837_v16  ;;  %v2913_v15 = vld [vmem:[#allocation5 + $0x520] ss:$16 sps:$4 sm:$0xff]   ;;  %v2918_v16 = vld [vmem:[#allocation5 + $0x14c] ss:$16 sps:$4 sm:$0xff]  }
  0x85   :  { %1479 = vmatprep.mubr.bf16.mxu1 %v3312_v21  ;;  %1490 = vmatprep.subr.bf16.mxu1 %v2840_v17  ;;  %v2921_v17 = vld [vmem:[#allocation5 + $0x504] ss:$16 sps:$4 sm:$0xff]  }
  0x86   :  { %1436 = vmatprep.mubr.bf16.mxu0 %v3390_v44 }
  0x87   :  { %1407 = vmatpush1.bf16.msra.mxu0 %v2835_v18  ;;  %v2916_v18 = vld [vmem:[#allocation5 + $0x148] ss:$16 sps:$4 sm:$0xff]  }
  0x88   :  { %1408 = vmatprep.subr.bf16.mxu0 %v2843_v22  ;;  %v106_v22 = vld [vmem:[#allocation2 + $0x58] sm:$0xff] }
  0x8b   :  { %2607 = vmatmul.mubr.msk.bf16.vlgmr.msra.gmra.mxu1 %vm1314_vm0, %v3385_v23  ;;  %1409 = vmatpush1.bf16.msra.mxu0 %v2841_v25  ;;  %v2927_v25 = vld [vmem:[#allocation5 + $0x2ec] ss:$16 sps:$4 sm:$0xff]  }
  0x8c   :  { %1491 = vmatpush1.bf16.msra.mxu1 %v2838_v24  ;;  %1410 = vmatprep.subr.bf16.mxu0 %v2849_v27  ;;  %v2924_v24 = vld [vmem:[#allocation5 + $0x12c] ss:$16 sps:$4 sm:$0xff]   ;;  %v2922_v27 = vld [vmem:[#allocation5 + $0x128] ss:$16 sps:$4 sm:$0xff]  }
  0x8d   :  { %1492 = vmatprep.subr.bf16.mxu1 %v2846_v26  ;;  %1522 = vmatprep.mubr.bf16.mxu1 %v3372_v53  ;;  %v2882_v53 = vld [vmem:[#allocation5 + $0xc] ss:$16 sps:$4 sm:$0xff]   ;;  %v3393_v26 = vpack.c.bf16 %v106_v22, %v99_v20  ;;  %v3006_v20 = vld [vmem:[#allocation5 + $0x568] ss:$16 sps:$4 sm:$0xff]  }
  0x8e   :  { %v3009_v22 = vld [vmem:[#allocation5 + $0x328] ss:$16 sps:$4 sm:$0xff]  }
  0x8f   :  { %1411 = vmatpush1.bf16.msra.mxu0 %v2847_v29  ;;  %v2930_v29 = vld [vmem:[#allocation5 + $0x10c] ss:$16 sps:$4 sm:$0xff]  }
  0x90   :  { %1493 = vmatpush1.bf16.msra.mxu1 %v2844_v28  ;;  %1412 = vmatprep.subr.bf16.mxu0 %v2855_v31  ;;  %v2925_v28 = vld [vmem:[#allocation5 + $0x2e8] ss:$16 sps:$4 sm:$0xff]  }
  0x91   :  { %1494 = vmatprep.subr.bf16.mxu1 %v2852_v30  ;;  %v2933_v30 = vld [vmem:[#allocation5 + $0x2cc] ss:$16 sps:$4 sm:$0xff]   ;;  %v2928_v31 = vld [vmem:[#allocation5 + $0x108] ss:$16 sps:$4 sm:$0xff]  }
  0x93   :  { %1413 = vmatpush1.bf16.msra.mxu0 %v2853_v33  ;;  %v2936_v33 = vld [vmem:[#allocation5 + $0x4ec] ss:$16 sps:$4 sm:$0xff]  }
  0x94   :  { %1495 = vmatpush1.bf16.msra.mxu1 %v2850_v32  ;;  %1414 = vmatprep.subr.bf16.mxu0 %v2861_v35  ;;  %v2931_v32 = vld [vmem:[#allocation5 + $0x2c8] ss:$16 sps:$4 sm:$0xff]  }
  0x95   :  { %1496 = vmatprep.subr.bf16.mxu1 %v2858_v34  ;;  %v2939_v34 = vld [vmem:[#allocation5 + $0x2ac] ss:$16 sps:$4 sm:$0xff]   ;;  %v2934_v35 = vld [vmem:[#allocation5 + $0x4e8] ss:$16 sps:$4 sm:$0xff]  }
  0x97   :  { %1415 = vmatpush1.bf16.msra.mxu0 %v2859_v37  ;;  %v2942_v37 = vld [vmem:[#allocation5 + $0x4cc] ss:$16 sps:$4 sm:$0xff]  }
  0x98   :  { %1497 = vmatpush1.bf16.msra.mxu1 %v2856_v36  ;;  %1416 = vmatprep.subr.bf16.mxu0 %v2867_v39  ;;  %v2937_v36 = vld [vmem:[#allocation5 + $0x2a8] ss:$16 sps:$4 sm:$0xff]  }
  0x99   :  { %1498 = vmatprep.subr.bf16.mxu1 %v2864_v38  ;;  %v2945_v38 = vld [vmem:[#allocation5 + $0x28c] ss:$16 sps:$4 sm:$0xff]   ;;  %v2940_v39 = vld [vmem:[#allocation5 + $0x4c8] ss:$16 sps:$4 sm:$0xff]  }
  0x9b   :  { %1417 = vmatpush1.bf16.msra.mxu0 %v2865_v43  ;;  %v2946_v43 = vld [vmem:[#allocation5 + $0x4a8] ss:$16 sps:$4 sm:$0xff]  }
  0x9c   :  { %1499 = vmatpush1.bf16.msra.mxu1 %v2862_v40  ;;  %1418 = vmatprep.subr.bf16.mxu0 %v2873_v46  ;;  %v2943_v40 = vld [vmem:[#allocation5 + $0x288] ss:$16 sps:$4 sm:$0xff]   ;;  %v2957_v46 = vld [vmem:[#allocation5 + $0x24c] ss:$16 sps:$4 sm:$0xff]  }
  0x9d   :  { %1500 = vmatprep.subr.bf16.mxu1 %v2870_v45  ;;  %v2949_v45 = vld [vmem:[#allocation5 + $0x268] ss:$16 sps:$4 sm:$0xff]  }
  0x9f   :  { %1419 = vmatpush1.bf16.msra.mxu0 %v2871_v48  ;;  %v2955_v48 = vld [vmem:[#allocation5 + $0x248] ss:$16 sps:$4 sm:$0xff]  }
  0xa0   :  { %1501 = vmatpush1.bf16.msra.mxu1 %v2868_v47  ;;  %1420 = vmatprep.subr.bf16.mxu0 %v2879_v50  ;;  %v2952_v47 = vld [vmem:[#allocation5 + $0x488] ss:$16 sps:$4 sm:$0xff]  }
  0xa1   :  { %1502 = vmatprep.subr.bf16.mxu1 %v2876_v49  ;;  %v2960_v49 = vld [vmem:[#allocation5 + $0x46c] ss:$16 sps:$4 sm:$0xff]   ;;  %v2958_v50 = vld [vmem:[#allocation5 + $0x468] ss:$16 sps:$4 sm:$0xff]  }
  0xa3   :  { %1421 = vmatpush2.bf16.msra.mxu0 %v2877_v52  ;;  %v2966_v52 = vld [vmem:[#allocation5 + $0x44c] ss:$16 sps:$4 sm:$0xff]  }
  0xa4   :  { %1503 = vmatpush1.bf16.msra.mxu1 %v2874_v51  ;;  %1422 = vmatprep.subr.bf16.mxu0 %v2885_v55  ;;  %v2961_v51 = vld [vmem:[#allocation5 + $0x228] ss:$16 sps:$4 sm:$0xff]  }
  0xa5   :  { %1504 = vmatprep.subr.bf16.mxu1 %v2882_v53  ;;  %v2969_v53 = vld [vmem:[#allocation5 + $0x20c] ss:$16 sps:$4 sm:$0xff]   ;;  %v2967_v55 = vld [vmem:[#allocation5 + $0x208] ss:$16 sps:$4 sm:$0xff]  }
  0xa7   :  { %1423 = vmatpush2.bf16.msra.mxu0 %v2883_v57  ;;  %v2975_v57 = vld [vmem:[#allocation5 + $0x3ec] ss:$16 sps:$4 sm:$0xff]  }
  0xa8   :  { %1505 = vmatpush1.bf16.msra.mxu1 %v2880_v56  ;;  %1424 = vmatprep.subr.bf16.mxu0 %v2891_v59  ;;  %v2972_v56 = vld [vmem:[#allocation5 + $0x42c] ss:$16 sps:$4 sm:$0xff]   ;;  %v2973_v59 = vld [vmem:[#allocation5 + $0x3e8] ss:$16 sps:$4 sm:$0xff]  }
  0xa9   :  { %1506 = vmatprep.subr.bf16.mxu1 %v2888_v58  ;;  %v2970_v58 = vld [vmem:[#allocation5 + $0x428] ss:$16 sps:$4 sm:$0xff]  }
  0xab   :  { %1425 = vmatpush2.bf16.msra.mxu0 %v2889_v61  ;;  %v2981_v61 = vld [vmem:[#allocation5 + $0x3cc] ss:$16 sps:$4 sm:$0xff]  }
  0xac   :  { %1507 = vmatpush2.bf16.msra.mxu1 %v2886_v60  ;;  %1426 = vmatprep.subr.bf16.mxu0 %v2897_v63  ;;  %v2978_v60 = vld [vmem:[#allocation5 + $0x40c] ss:$16 sps:$4 sm:$0xff]   ;;  %v2979_v63 = vld [vmem:[#allocation5 + $0x3c8] ss:$16 sps:$4 sm:$0xff]  }
  0xad   :  { %1508 = vmatprep.subr.bf16.mxu1 %v2894_v62  ;;  %v2976_v62 = vld [vmem:[#allocation5 + $0x408] ss:$16 sps:$4 sm:$0xff]  }
  0xaf   :  { %1427 = vmatpush2.bf16.msra.mxu0 %v2895_v1  ;;  %v2987_v1 = vld [vmem:[#allocation5 + $0x3ac] ss:$16 sps:$4 sm:$0xff]  }
  0xb0   :  { %1509 = vmatpush2.bf16.msra.mxu1 %v2892_v0  ;;  %1428 = vmatprep.subr.bf16.mxu0 %v2903_v3  ;;  %v2984_v0 = vld [vmem:[#allocation5 + $0x5ec] ss:$16 sps:$4 sm:$0xff]   ;;  %v2985_v3 = vld [vmem:[#allocation5 + $0x3a8] ss:$16 sps:$4 sm:$0xff]  }
  0xb1   :  { %1510 = vmatprep.subr.bf16.mxu1 %v2900_v2  ;;  %v2982_v2 = vld [vmem:[#allocation5 + $0x5e8] ss:$16 sps:$4 sm:$0xff]  }
  0xb3   :  { %1429 = vmatpush2.bf16.msra.mxu0 %v2901_v5  ;;  %v2993_v5 = vld [vmem:[#allocation5 + $0x38c] ss:$16 sps:$4 sm:$0xff]  }
  0xb4   :  { %1511 = vmatpush2.bf16.msra.mxu1 %v2898_v4  ;;  %1430 = vmatprep.subr.bf16.mxu0 %v2909_v7  ;;  %v2990_v4 = vld [vmem:[#allocation5 + $0x5cc] ss:$16 sps:$4 sm:$0xff]   ;;  %v2991_v7 = vld [vmem:[#allocation5 + $0x388] ss:$16 sps:$4 sm:$0xff]  }
  0xb5   :  { %1512 = vmatprep.subr.bf16.mxu1 %v2906_v6  ;;  %v2988_v6 = vld [vmem:[#allocation5 + $0x5c8] ss:$16 sps:$4 sm:$0xff]  }
  0xb7   :  { %1431 = vmatpush2.bf16.msra.mxu0 %v2907_v9  ;;  %v2999_v9 = vld [vmem:[#allocation5 + $0x36c] ss:$16 sps:$4 sm:$0xff]  }
  0xb8   :  { %1513 = vmatpush2.bf16.msra.mxu1 %v2904_v8  ;;  %1432 = vmatprep.subr.bf16.mxu0 %v2915_v11  ;;  %v2996_v8 = vld [vmem:[#allocation5 + $0x5ac] ss:$16 sps:$4 sm:$0xff]   ;;  %v2997_v11 = vld [vmem:[#allocation5 + $0x368] ss:$16 sps:$4 sm:$0xff]  }
  0xb9   :  { %1514 = vmatprep.subr.bf16.mxu1 %v2912_v10  ;;  %v2994_v10 = vld [vmem:[#allocation5 + $0x5a8] ss:$16 sps:$4 sm:$0xff]  }
  0xbb   :  { %1433 = vmatpush2.bf16.msra.mxu0 %v2913_v15  ;;  %v3005_v15 = vld [vmem:[#allocation5 + $0x34c] ss:$16 sps:$4 sm:$0xff]  }
  0xbc   :  { %1515 = vmatpush2.bf16.msra.mxu1 %v2910_v14  ;;  %1434 = vmatprep.subr.bf16.mxu0 %v2921_v17  ;;  %v3002_v14 = vld [vmem:[#allocation5 + $0x58c] ss:$16 sps:$4 sm:$0xff]   ;;  %v3003_v17 = vld [vmem:[#allocation5 + $0x348] ss:$16 sps:$4 sm:$0xff]  }
  0xbd   :  { %1516 = vmatprep.subr.bf16.mxu1 %v2918_v16  ;;  %v3000_v16 = vld [vmem:[#allocation5 + $0x588] ss:$16 sps:$4 sm:$0xff]  }
  0xbf   :  { %1435 = vmatpush2.bf16.msra.mxu0 %v2919_v19  ;;  %v3011_v19 = vld [vmem:[#allocation5 + $0x32c] ss:$16 sps:$4 sm:$0xff]  }
  0xc0   :  { %1517 = vmatpush2.bf16.msra.mxu1 %v2916_v18  ;;  %1533 = vmatprep.subr.bf16.mxu0 %v2927_v25  ;;  %v3008_v18 = vld [vmem:[#allocation5 + $0x56c] ss:$16 sps:$4 sm:$0xff]  }
  0xc1   :  { %1518 = vmatprep.subr.bf16.mxu1 %v2924_v24  ;;  %v3014_v24 = vld [vmem:[#allocation5 + $0x54c] ss:$16 sps:$4 sm:$0xff]  }
  0xc2   :  { %1437 = vmatmul.mubr.bf16.vlgmr.msra.gmra.mxu0 %v3393_v26  ;;  %v3017_v25 = vld [vmem:[#allocation5 + $0x30c] ss:$16 sps:$4 sm:$0xff]  }
  0xc3   :  { %1534 = vmatpush1.bf16.msra.mxu0 %v2925_v28  ;;  %1565 = vmatprep.mubr.bf16.mxu0 %v3374_v54  ;;  %v2954_v54 = vld [vmem:[#allocation5 + $0x48c] ss:$16 sps:$4 sm:$0xff]   ;;  %v3015_v28 = vld [vmem:[#allocation5 + $0x308] ss:$16 sps:$4 sm:$0xff]  }
  0xc4   :  { %1519 = vmatpush2.bf16.msra.mxu1 %v2922_v27  ;;  %1535 = vmatprep.subr.bf16.mxu0 %v2933_v30  ;;  %v3012_v27 = vld [vmem:[#allocation5 + $0x548] ss:$16 sps:$4 sm:$0xff]  }
  0xc5   :  { %1520 = vmatprep.subr.bf16.mxu1 %v2930_v29  ;;  %v3020_v29 = vld [vmem:[#allocation5 + $0x52c] ss:$16 sps:$4 sm:$0xff]   ;;  %v3029_v30 = vld [vmem:[#allocation8 + $0x74] ss:$8 sps:$4 sm:$0xff]  }
  0xc7   :  { %1536 = vmatpush1.bf16.msra.mxu0 %v2931_v32  ;;  %v3027_v32 = vld [vmem:[#allocation8 + $0x70] ss:$8 sps:$4 sm:$0xff]  }
  0xc8   :  { %1521 = vmatpush2.bf16.msra.mxu1 %v2928_v31  ;;  %1537 = vmatprep.subr.bf16.mxu0 %v2939_v34  ;;  %v3018_v31 = vld [vmem:[#allocation5 + $0x528] ss:$16 sps:$4 sm:$0xff]  }
  0xc9   :  { %1576 = vmatprep.subr.bf16.mxu1 %v2936_v33  ;;  %v3023_v33 = vld [vmem:[#allocation5 + $0x50c] ss:$16 sps:$4 sm:$0xff]   ;;  %v3032_v34 = vld [vmem:[#allocation8 + $0x64] ss:$8 sps:$4 sm:$0xff]  }
  0xcb   :  { %1523 = vmatmul.mubr.bf16.vlgmr.msra.gmra.mxu1 %v3378_v12  ;;  %1538 = vmatpush1.bf16.msra.mxu0 %v2937_v36  ;;  %v2963_v12 = vld [vmem:[#allocation5 + $0x22c] ss:$16 sps:$4 sm:$0xff]  }
  0xcc   :  { %1577 = vmatpush1.bf16.msra.mxu1 %v2934_v35  ;;  %1539 = vmatprep.subr.bf16.mxu0 %v2945_v38  ;;  %v3021_v35 = vld [vmem:[#allocation5 + $0x508] ss:$16 sps:$4 sm:$0xff]   ;;  %v3030_v36 = vld [vmem:[#allocation8 + $0x60] ss:$8 sps:$4 sm:$0xff]  }
  0xcd   :  { %1578 = vmatprep.subr.bf16.mxu1 %v2942_v37  ;;  %1608 = vmatprep.mubr.bf16.mxu1 %v3390_v44  ;;  %v2964_v44 = vld [vmem:[#allocation5 + $0x448] ss:$16 sps:$4 sm:$0xff]   ;;  %v3026_v37 = vld [vmem:[#allocation5 + $0x60c] ss:$16 sps:$4 sm:$0xff]  }
  0xce   :  { %v3035_v38 = vld [vmem:[#allocation8 + $0x54] ss:$8 sps:$4 sm:$0xff]  }
  0xcf   :  { %1540 = vmatpush1.bf16.msra.mxu0 %v2943_v40  ;;  %v3033_v40 = vld [vmem:[#allocation8 + $0x50] ss:$8 sps:$4 sm:$0xff]  }
  0xd0   :  { %1579 = vmatpush1.bf16.msra.mxu1 %v2940_v39  ;;  %1541 = vmatprep.subr.bf16.mxu0 %v2951_v42  ;;  %v3024_v39 = vld [vmem:[#allocation5 + $0x608] ss:$16 sps:$4 sm:$0xff]  }
  0xd1   :  { %1580 = vmatprep.subr.bf16.mxu1 %v2948_v41  ;;  %v3038_v41 = vld [vmem:[#allocation8 + $0x44] ss:$8 sps:$4 sm:$0xff]   ;;  %v3041_v42 = vld [vmem:[#allocation8 + $0x34] ss:$8 sps:$4 sm:$0xff]  }
  0xd3   :  { %1542 = vmatpush1.bf16.msra.mxu0 %v2949_v45  ;;  %v3044_v45 = vld [vmem:[#allocation8 + $0x24] ss:$8 sps:$4 sm:$0xff]  }
  0xd4   :  { %1581 = vmatpush1.bf16.msra.mxu1 %v2946_v43  ;;  %1543 = vmatprep.subr.bf16.mxu0 %v2957_v46  ;;  %v3039_v43 = vld [vmem:[#allocation8 + $0x30] ss:$8 sps:$4 sm:$0xff]   ;;  %v3047_v46 = vld [vmem:[#allocation8 + $0x14] ss:$8 sps:$4 sm:$0xff]  }
  0xd5   :  { %1582 = vmatprep.subr.bf16.mxu1 %v2954_v54  ;;  %v3042_v54 = vld [vmem:[#allocation8 + $0x20] ss:$8 sps:$4 sm:$0xff]  }
  0xd7   :  { %1544 = vmatpush1.bf16.msra.mxu0 %v2955_v48  ;;  %v3053_v48 = vld [vmem:[#allocation8 + $0xf4] ss:$8 sps:$4 sm:$0xff]  }
  0xd8   :  { %1583 = vmatpush1.bf16.msra.mxu1 %v2952_v47  ;;  %1545 = vmatprep.subr.bf16.mxu0 %v2963_v12  ;;  %v3050_v47 = vld [vmem:[#allocation8 + $0x4] ss:$8 sps:$4 sm:$0xff]  }
  0xd9   :  { %1584 = vmatprep.subr.bf16.mxu1 %v2960_v49  ;;  %v3051_v49 = vld [vmem:[#allocation8 + $0xf0] ss:$8 sps:$4 sm:$0xff]   ;;  %v3056_v12 = vld [vmem:[#allocation8 + $0xe4] ss:$8 sps:$4 sm:$0xff]  }
  0xdb   :  { %1546 = vmatpush1.bf16.msra.mxu0 %v2961_v51  ;;  %v3057_v51 = vld [vmem:[#allocation8 + $0xd0] ss:$8 sps:$4 sm:$0xff]  }
  0xdc   :  { %1585 = vmatpush1.bf16.msra.mxu1 %v2958_v50  ;;  %1547 = vmatprep.subr.bf16.mxu0 %v2969_v53  ;;  %v3054_v50 = vld [vmem:[#allocation8 + $0xe0] ss:$8 sps:$4 sm:$0xff]  }
  0xdd   :  { %1586 = vmatprep.subr.bf16.mxu1 %v2966_v52  ;;  %v3062_v52 = vld [vmem:[#allocation8 + $0xc4] ss:$8 sps:$4 sm:$0xff]   ;;  %v3060_v53 = vld [vmem:[#allocation8 + $0xc0] ss:$8 sps:$4 sm:$0xff]  }
  0xdf   :  { %1548 = vmatpush1.bf16.msra.mxu0 %v2967_v55  ;;  %v3063_v55 = vld [vmem:[#allocation8 + $0xb0] ss:$8 sps:$4 sm:$0xff]  }
  0xe0   :  { %1587 = vmatpush1.bf16.msra.mxu1 %v2964_v44  ;;  %1549 = vmatprep.subr.bf16.mxu0 %v2975_v57  ;;  %v3065_v44 = vld [vmem:[#allocation8 + $0xb4] ss:$8 sps:$4 sm:$0xff]   ;;  %v3066_v57 = vld [vmem:[#allocation8 + $0xa0] ss:$8 sps:$4 sm:$0xff]  }
  0xe1   :  { %1588 = vmatprep.subr.bf16.mxu1 %v2972_v56  ;;  %v3068_v56 = vld [vmem:[#allocation8 + $0xa4] ss:$8 sps:$4 sm:$0xff]  }
  0xe3   :  { %1550 = vmatpush2.bf16.msra.mxu0 %v2973_v59  ;;  %v3077_v59 = vld [vmem:[#allocation8 + $0x174] ss:$8 sps:$4 sm:$0xff]  }
  0xe4   :  { %1589 = vmatpush1.bf16.msra.mxu1 %v2970_v58  ;;  %1551 = vmatprep.subr.bf16.mxu0 %v2981_v61  ;;  %v3075_v58 = vld [vmem:[#allocation8 + $0x170] ss:$8 sps:$4 sm:$0xff]  }
  0xe5   :  { %1590 = vmatprep.subr.bf16.mxu1 %v2978_v60  ;;  %v3071_v60 = vld [vmem:[#allocation8 + $0x94] ss:$8 sps:$4 sm:$0xff]   ;;  %v3069_v61 = vld [vmem:[#allocation8 + $0x90] ss:$8 sps:$4 sm:$0xff]  }
  0xe7   :  { %1552 = vmatpush2.bf16.msra.mxu0 %v2979_v63  ;;  %v3072_v63 = vld [vmem:[#allocation8 + $0x80] ss:$8 sps:$4 sm:$0xff]  }
  0xe8   :  { %1591 = vmatpush1.bf16.msra.mxu1 %v2976_v62  ;;  %1553 = vmatprep.subr.bf16.mxu0 %v2987_v1  ;;  %v3074_v62 = vld [vmem:[#allocation8 + $0x84] ss:$8 sps:$4 sm:$0xff]   ;;  %v3078_v1 = vld [vmem:[#allocation8 + $0x160] ss:$8 sps:$4 sm:$0xff]  }
  0xe9   :  { %1592 = vmatprep.subr.bf16.mxu1 %v2984_v0  ;;  %v3080_v0 = vld [vmem:[#allocation8 + $0x164] ss:$8 sps:$4 sm:$0xff]  }
  0xeb   :  { %1554 = vmatpush2.bf16.msra.mxu0 %v2985_v3  ;;  %v3081_v3 = vld [vmem:[#allocation8 + $0x150] ss:$8 sps:$4 sm:$0xff]  }
  0xec   :  { %1593 = vmatpush2.bf16.msra.mxu1 %v2982_v2  ;;  %1555 = vmatprep.subr.bf16.mxu0 %v2993_v5  ;;  %v3083_v2 = vld [vmem:[#allocation8 + $0x154] ss:$8 sps:$4 sm:$0xff]   ;;  %v3084_v5 = vld [vmem:[#allocation8 + $0x140] ss:$8 sps:$4 sm:$0xff]  }
  0xed   :  { %1594 = vmatprep.subr.bf16.mxu1 %v2990_v4  ;;  %v3086_v4 = vld [vmem:[#allocation8 + $0x144] ss:$8 sps:$4 sm:$0xff]  }
  0xef   :  { %1556 = vmatpush2.bf16.msra.mxu0 %v2991_v7  ;;  %v3087_v7 = vld [vmem:[#allocation8 + $0x130] ss:$8 sps:$4 sm:$0xff]  }
  0xf0   :  { %1595 = vmatpush2.bf16.msra.mxu1 %v2988_v6  ;;  %1557 = vmatprep.subr.bf16.mxu0 %v2999_v9  ;;  %v3089_v6 = vld [vmem:[#allocation8 + $0x134] ss:$8 sps:$4 sm:$0xff]   ;;  %v3090_v9 = vld [vmem:[#allocation8 + $0x120] ss:$8 sps:$4 sm:$0xff]  }
  0xf1   :  { %1596 = vmatprep.subr.bf16.mxu1 %v2996_v8  ;;  %v3092_v8 = vld [vmem:[#allocation8 + $0x124] ss:$8 sps:$4 sm:$0xff]  }
  0xf3   :  { %1558 = vmatpush2.bf16.msra.mxu0 %v2997_v11  ;;  %v3093_v11 = vld [vmem:[#allocation8 + $0x110] ss:$8 sps:$4 sm:$0xff]  }
  0xf4   :  { %1597 = vmatpush2.bf16.msra.mxu1 %v2994_v10  ;;  %1559 = vmatprep.subr.bf16.mxu0 %v3005_v15  ;;  %v3095_v10 = vld [vmem:[#allocation8 + $0x114] ss:$8 sps:$4 sm:$0xff]   ;;  %v3096_v15 = vld [vmem:[#allocation8 + $0x100] ss:$8 sps:$4 sm:$0xff]  }
  0xf5   :  { %1598 = vmatprep.subr.bf16.mxu1 %v3002_v14  ;;  %v3098_v14 = vld [vmem:[#allocation8 + $0x104] ss:$8 sps:$4 sm:$0xff]  }
  0xf7   :  { %1560 = vmatpush2.bf16.msra.mxu0 %v3003_v17  ;;  %v3099_v17 = vld [vmem:[#allocation8 + $0x1f0] ss:$8 sps:$4 sm:$0xff]  }
  0xf8   :  { %1599 = vmatpush2.bf16.msra.mxu1 %v3000_v16  ;;  %1561 = vmatprep.subr.bf16.mxu0 %v3011_v19  ;;  %v3101_v16 = vld [vmem:[#allocation8 + $0x1f4] ss:$8 sps:$4 sm:$0xff]   ;;  %v3102_v19 = vld [vmem:[#allocation8 + $0x1e0] ss:$8 sps:$4 sm:$0xff]  }
  0xf9   :  { %1600 = vmatprep.subr.bf16.mxu1 %v3008_v18  ;;  %v3104_v18 = vld [vmem:[#allocation8 + $0x1e4] ss:$8 sps:$4 sm:$0xff]  }
  0xfb   :  { %1562 = vmatpush2.bf16.msra.mxu0 %v3009_v22  ;;  %v3105_v22 = vld [vmem:[#allocation8 + $0x1d0] ss:$8 sps:$4 sm:$0xff]  }
  0xfc   :  { %1601 = vmatpush2.bf16.msra.mxu1 %v3006_v20  ;;  %1563 = vmatprep.subr.bf16.mxu0 %v3017_v25  ;;  %v3107_v20 = vld [vmem:[#allocation8 + $0x1d4] ss:$8 sps:$4 sm:$0xff]   ;;  %v3108_v25 = vld [vmem:[#allocation8 + $0x1c0] ss:$8 sps:$4 sm:$0xff]  }
  0xfd   :  { %1602 = vmatprep.subr.bf16.mxu1 %v3014_v24  ;;  %v3110_v24 = vld [vmem:[#allocation8 + $0x1c4] ss:$8 sps:$4 sm:$0xff]  }
  0xff   :  { %1564 = vmatpush2.bf16.msra.mxu0 %v3015_v28  ;;  %v3113_v28 = vld [vmem:[#allocation8 + $0x1b4] ss:$8 sps:$4 sm:$0xff]  }
 0x100   :  { %1603 = vmatpush2.bf16.msra.mxu1 %v3012_v27  ;;  %2090 = vmatprep.subr.bf16.mxu0 %v3029_v30  ;;  %v3111_v30 = vld [vmem:[#allocation8 + $0x1b0] ss:$8 sps:$4 sm:$0xff]  }
 0x101   :  { %1604 = vmatprep.subr.bf16.mxu1 %v3020_v29  ;;  %v314_v29 = vlaneseq }
 0x102   :  { %1566 = vmatmul.mubr.bf16.vlgmr.msra.gmra.mxu0 %v3380_v13  ;;  %v3036_v13 = vld [vmem:[#allocation8 + $0x40] ss:$8 sps:$4 sm:$0xff]  }
 0x103   :  { %2091 = vmatpush1.bf16.msra.mxu0 %v3027_v32 }
 0x104   :  { %1605 = vmatpush2.bf16.msra.mxu1 %v3018_v31  ;;  %2092 = vmatprep.subr.bf16.mxu0 %v3032_v34  ;;  %v3116_v31 = vld [vmem:[#allocation8 + $0x1a4] ss:$8 sps:$4 sm:$0xff]   ;;  %v3114_v34 = vld [vmem:[#allocation8 + $0x1a0] ss:$8 sps:$4 sm:$0xff]  }
 0x105   :  { %1606 = vmatprep.subr.bf16.mxu1 %v3023_v33  ;;  %v3404_v33 = vshrl.u32 %v314_v29, 7 }
 0x107   :  { %2093 = vmatpush1.bf16.msra.mxu0 %v3030_v36  ;;  %v3119_v36 = vld [vmem:[#allocation8 + $0x194] ss:$8 sps:$4 sm:$0xff]  }
 0x108   :  { %1607 = vmatpush2.bf16.msra.mxu1 %v3021_v35  ;;  %2094 = vmatprep.subr.bf16.mxu0 %v3035_v38  ;;  %v316_v38 = vsub.s32 0, %v3404_v33 }
 0x109   :  { %1633 = vmatprep.subr.bf16.mxu1 %v3026_v37 }
 0x10b   :  { %1609 = vmatmul.mubr.bf16.vlgmr.msra.gmra.mxu1 %v3393_v26  ;;  %2095 = vmatpush1.bf16.msra.mxu0 %v3033_v40  ;;  %v3045_v26 = vld [vmem:[#allocation8 + $0x10] ss:$8 sps:$4 sm:$0xff]   ;;  %v3407_v40 = vld [vmem:[#allocation7] sm:$0xf] }
 0x10c   :  { %1634 = vmatpush1.bf16.msra.mxu1 %v3024_v39  ;;  %1651 = vmatprep.mubr.bf16.mxu1 %v3312_v21  ;;  %v3048_v21 = vld [vmem:[#allocation8] ss:$8 sps:$4 sm:$0xff]   ;;  %v3117_v39 = vld [vmem:[#allocation8 + $0x190] ss:$8 sps:$4 sm:$0xff]  }
 0x10d   :  { %2096 = vmatprep.subr.bf16.mxu0 %v3038_v41  ;;  %2133 = vmatprep.subr.bf16.mxu1 %v3077_v59 }
 0x10f   :  { %2097 = vmatpush1.bf16.msra.mxu0 %v3036_v13  ;;  %v3122_v13 = vld [vmem:[#allocation8 + $0x184] ss:$8 sps:$4 sm:$0xff]  }
 0x110   :  { %2098 = vmatprep.subr.bf16.mxu0 %v3041_v42  ;;  %v320_v42 = vsub.s32 1, %v3404_v33 }
 0x113   :  { %2608 = vmatmul.mubr.msk.bf16.vlgmr.msra.gmra.mxu1 %vm1314_vm0, %v3385_v23  ;;  %2099 = vmatpush1.bf16.msra.mxu0 %v3039_v43  ;;  %v3059_v23 = vld [vmem:[#allocation8 + $0xd4] ss:$8 sps:$4 sm:$0xff]  }
 0x114   :  { %2100 = vmatprep.subr.bf16.mxu0 %v3044_v45  ;;  %2134 = vmatpush1.bf16.msra.mxu1 %v3075_v58  ;;  %v317_v45 = vrot.slane %v3407_v40, %v316_v38 }
 0x115   :  { %2135 = vmatprep.subr.bf16.mxu1 %v3080_v0 }
 0x117   :  { %2101 = vmatpush1.bf16.msra.mxu0 %v3042_v54  ;;  %v3120_v54 = vld [vmem:[#allocation8 + $0x180] ss:$8 sps:$4 sm:$0xff]  }
 0x118   :  { %2102 = vmatprep.subr.bf16.mxu0 %v3047_v46  ;;  %2136 = vmatpush1.bf16.msra.mxu1 %v3078_v1 }
 0x119   :  { %2137 = vmatprep.subr.bf16.mxu1 %v3083_v2 }
 0x11b   :  { %2103 = vmatpush1.bf16.msra.mxu0 %v3045_v26  ;;  %v321_v26 = vrot.slane %v3407_v40, %v320_v42 }
 0x11c   :  { %2104 = vmatprep.subr.bf16.mxu0 %v3050_v47  ;;  %2138 = vmatpush1.bf16.msra.mxu1 %v3081_v3 }
 0x11d   :  { %2139 = vmatprep.subr.bf16.mxu1 %v3086_v4 }
 0x11f   :  { %2105 = vmatpush1.bf16.msra.mxu0 %v3048_v21 }
 0x120   :  { %2106 = vmatprep.subr.bf16.mxu0 %v3053_v48  ;;  %2140 = vmatpush1.bf16.msra.mxu1 %v3084_v5 }
 0x121   :  { %2141 = vmatprep.subr.bf16.mxu1 %v3089_v6 }
 0x123   :  { %2107 = vmatpush2.bf16.msra.mxu0 %v3051_v49 }
 0x124   :  { %2108 = vmatprep.subr.bf16.mxu0 %v3056_v12  ;;  %2142 = vmatpush1.bf16.msra.mxu1 %v3087_v7 }
 0x125   :  { %2143 = vmatprep.subr.bf16.mxu1 %v3092_v8 }
 0x127   :  { %2109 = vmatpush2.bf16.msra.mxu0 %v3054_v50 }
 0x128   :  { %2110 = vmatprep.subr.bf16.mxu0 %v3059_v23  ;;  %2144 = vmatpush1.bf16.msra.mxu1 %v3090_v9 }
 0x129   :  { %2145 = vmatprep.subr.bf16.mxu1 %v3095_v10 }
 0x12b   :  { %2111 = vmatpush2.bf16.msra.mxu0 %v3057_v51 }
 0x12c   :  { %2112 = vmatprep.subr.bf16.mxu0 %v3062_v52  ;;  %2146 = vmatpush1.bf16.msra.mxu1 %v3093_v11 }
 0x12d   :  { %2147 = vmatprep.subr.bf16.mxu1 %v3098_v14 }
 0x12f   :  { %2113 = vmatpush2.bf16.msra.mxu0 %v3060_v53 }
 0x130   :  { %2114 = vmatprep.subr.bf16.mxu0 %v3065_v44  ;;  %2148 = vmatpush1.bf16.msra.mxu1 %v3096_v15 }
 0x131   :  { %2149 = vmatprep.subr.bf16.mxu1 %v3101_v16 }
 0x133   :  { %2115 = vmatpush2.bf16.msra.mxu0 %v3063_v55 }
 0x134   :  { %2116 = vmatprep.subr.bf16.mxu0 %v3068_v56  ;;  %2150 = vmatpush2.bf16.msra.mxu1 %v3099_v17 }
 0x135   :  { %2151 = vmatprep.subr.bf16.mxu1 %v3104_v18 }
 0x137   :  { %2117 = vmatpush2.bf16.msra.mxu0 %v3066_v57 }
 0x138   :  { %2118 = vmatprep.subr.bf16.mxu0 %v3071_v60  ;;  %2152 = vmatpush2.bf16.msra.mxu1 %v3102_v19 }
 0x139   :  { %2153 = vmatprep.subr.bf16.mxu1 %v3107_v20 }
 0x13b   :  { %2119 = vmatpush2.bf16.msra.mxu0 %v3069_v61 }
 0x13c   :  { %2120 = vmatprep.subr.bf16.mxu0 %v3074_v62  ;;  %2154 = vmatpush2.bf16.msra.mxu1 %v3105_v22 }
 0x13d   :  { %2155 = vmatprep.subr.bf16.mxu1 %v3110_v24 }
 0x13f   :  { %2121 = vmatpush2.bf16.msra.mxu0 %v3072_v63 }
 0x140   :  { %2156 = vmatpush2.bf16.msra.mxu1 %v3108_v25 }
 0x141   :  { %2157 = vmatprep.subr.bf16.mxu1 %v3113_v28 }
 0x142   :  { %v1352_v35 = vpop.f32.mrf.mxu0 }
 0x143   :  { %v1395_v27 = vpop.f32.mrf.mxu1  ;;  %v1353_v21 = vadd.f32 %v1352_v35, %v317_v45 }
 0x144   :  { %2158 = vmatpush2.bf16.msra.mxu1 %v3111_v30  ;;  %v1354_v41 = vpop.f32.mrf.mxu0  ;;  %v328_v30 = vsub.s32 3, %v3404_v33 }
 0x145   :  { %v1397_v32 = vpop.f32.mrf.mxu1  ;;  %2159 = vmatprep.subr.bf16.mxu1 %v3116_v31  ;;  %v1355_v49 = vadd.f32 %v1354_v41, %v321_v26  ;;  %v1396_v51 = vadd.f32 %v1395_v27, %v1353_v21  ;;  %v324_v27 = vsub.s32 2, %v3404_v33 }
 0x146   :  { %v1356_v46 = vpop.f32.mrf.mxu0 }
 0x147   :  { %v1399_v37 = vpop.f32.mrf.mxu1  ;;  %v1357_v12 = vadd.f32 %v1356_v46, %v317_v45  ;;  %v1398_v44 = vadd.f32 %v1397_v32, %v1355_v49  ;;  %v325_v32 = vrot.slane %v3407_v40, %v324_v27  ;;  %v1758_v27 = vld [vmem:[%s3440_s4] sm:$0x3] }
 0x148   :  { %2160 = vmatpush2.bf16.msra.mxu1 %v3114_v34  ;;  %v1358_v48 = vpop.f32.mrf.mxu0 }
 0x149   :  { %2161 = vmatprep.subr.bf16.mxu1 %v3119_v36  ;;  %v1401_v43 = vpop.f32.mrf.mxu1  ;;  %v1359_v52 = vadd.f32 %v1358_v48, %v321_v26  ;;  %v1400_v55 = vadd.f32 %v1399_v37, %v1357_v12  ;;  %v329_v36 = vrot.slane %v3407_v40, %v328_v30 }
 0x14b   :  { %v1481_v47 = vpop.f32.mrf.mxu1  ;;  %v1402_v59 = vadd.f32 %v1401_v43, %v1359_v52 }
 0x14c   :  { %2162 = vmatpush2.bf16.msra.mxu1 %v3117_v39 }
 0x14d   :  { %2163 = vmatprep.subr.bf16.mxu1 %v3122_v13  ;;  %v1483_v50 = vpop.f32.mrf.mxu1 }
 0x14f   :  { %v1485_v57 = vpop.f32.mrf.mxu1 }
 0x150   :  { %2164 = vmatpush2.bf16.msra.mxu1 %v3120_v54 }
 0x151   :  { %v1487_v2 = vpop.f32.mrf.mxu1 }
 0x182   :  { %v1438_v23 = vpop.f32.mrf.mxu0 }
 0x183   :  { %v1439_v56 = vadd.f32 %v1438_v23, %v1396_v51 }
 0x184   :  { %v1440_v53 = vpop.f32.mrf.mxu0 }
 0x185   :  { %v1441_v60 = vadd.f32 %v1440_v53, %v1398_v44  ;;  %v1482_v63 = vadd.f32 %v1481_v47, %v1439_v56 }
 0x186   :  { %v1442_v58 = vpop.f32.mrf.mxu0 }
 0x187   :  { %v1443_v61 = vadd.f32 %v1442_v58, %v1400_v55  ;;  %v1484_v3 = vadd.f32 %v1483_v50, %v1441_v60 }
 0x188   :  { %v1444_v62 = vpop.f32.mrf.mxu0 }
 0x189   :  { %v1486_v0 = vadd.f32 %v1485_v57, %v1443_v61  ;;  %v1445_v1 = vadd.f32 %v1444_v62, %v1402_v59 }
 0x18b   :  { %v1662_v4 = vpack.c.bf16 %v1486_v0, %v1482_v63  ;;  %v1488_v5 = vadd.f32 %v1487_v2, %v1445_v1  ;;  %v1524_v19 = vpop.f32.mrf.mxu1 }
 0x18c   :  { %v1525_v39 = vadd.f32 %v1524_v19, %v325_v32  ;;  %v3136_v19 = vld [vmem:[#allocation10 + $0x8] sm:$0xff]  }
 0x18d   :  { %v2609_v6 = vmul.bf16 3216621497, %v1662_v4  ;;  %v1663_v7 = vpack.c.bf16 %v1488_v5, %v1484_v3  ;;  %v1526_v20 = vpop.f32.mrf.mxu1  ;;  %v3123_v4 = vld [vmem:[#allocation10 + $0x78] sm:$0xff]  }
 0x18e   :  { %v1527_v45 = vadd.f32 %v1526_v20, %v329_v36  ;;  %v3124_v5 = vld [vmem:[#allocation10 + $0x38] sm:$0xff]   ;;  %2696 = vmatprep.subr.bf16.mxu0 %v3123_v4  ;;  %v3137_v20 = vld [vmem:[#allocation10 + $0x40] sm:$0xff]  }
 0x18f   :  { %3139 = vpow.bf16 %v2609_v6  ;;  %v2610_v8 = vmul.bf16 3216621497, %v1663_v7  ;;  %v1528_v22 = vpop.f32.mrf.mxu1  ;;  %v3125_v6 = vld [vmem:[#allocation10 + $0x70] sm:$0xff]  }
 0x190   :  { %v1529_v41 = vadd.f32 %v1528_v22, %v325_v32  ;;  %v3126_v7 = vld [vmem:[#allocation10 + $0x30] sm:$0xff]   ;;  %v3138_v22 = vld [vmem:[#allocation10] sm:$0xff]  }
 0x191   :  { %3141 = vpow.bf16 %v2610_v8  ;;  %v1530_v25 = vpop.f32.mrf.mxu1  ;;  %v3127_v8 = vld [vmem:[#allocation10 + $0x68] sm:$0xff]  }
 0x192   :  { %v1531_v54 = vadd.f32 %v1530_v25, %v329_v36 }
 0x19d   :  { %v3140_v9 = vpop.eup %3139 }
 0x19e   :  { %v1682_v10 = vadd.bf16 1065369472, %v3140_v9  ;;  %v3128_v9 = vld [vmem:[#allocation10 + $0x28] sm:$0xff]  }
 0x19f   :  { %v3142_v11 = vpop.eup %3141 }
 0x1a0   :  { %v1683_v14 = vadd.bf16 1065369472, %v3142_v11  ;;  %3143 = vrcp.bf16 %v1682_v10  ;;  %v3129_v10 = vld [vmem:[#allocation10 + $0x60] sm:$0xff]  }
 0x1a1   :  { %v3130_v11 = vld [vmem:[#allocation10 + $0x20] sm:$0xff]  }
 0x1a2   :  { %3145 = vrcp.bf16 %v1683_v14  ;;  %v3131_v14 = vld [vmem:[#allocation10 + $0x58] sm:$0xff]  }
 0x1ae   :  { %v3144_v15 = vpop.eup %3143 }
 0x1af   :  { %v1687_v18 = vmul.bf16 1065369472, %v3144_v15  ;;  %v3132_v15 = vld [vmem:[#allocation10 + $0x18] sm:$0xff]  }
 0x1b0   :  { %v3146_v16 = vpop.eup %3145 }
 0x1b1   :  { %v1689_v17 = vmul.bf16 1065369472, %v3146_v16  ;;  %v3133_v16 = vld [vmem:[#allocation10 + $0x50] sm:$0xff]  }
 0x1b3   :  { %2122 = vmatprep.mubr.bf16.mxu0 %v1689_v17  ;;  %v3134_v17 = vld [vmem:[#allocation10 + $0x10] sm:$0xff]  }
 0x1b4   :  { %2123 = vmatmul.mubr.bf16.vlgmr.msra.gmra.mxu0 %v1687_v18  ;;  %v3135_v18 = vld [vmem:[#allocation10 + $0x48] sm:$0xff]  }
 0x1b5   :  { %2697 = vmatpush3.bf16.msra.mxu0 %v3124_v5 }
 0x1b6   :  { %2698 = vmatprep.subr.bf16.mxu0 %v3125_v6 }
 0x1b9   :  { %2699 = vmatpush3.bf16.msra.mxu0 %v3126_v7 }
 0x1ba   :  { %2700 = vmatprep.subr.bf16.mxu0 %v3127_v8 }
 0x1bd   :  { %2701 = vmatpush3.bf16.msra.mxu0 %v3128_v9 }
 0x1be   :  { %2702 = vmatprep.subr.bf16.mxu0 %v3129_v10 }
 0x1c1   :  { %2703 = vmatpush3.bf16.msra.mxu0 %v3130_v11 }
 0x1c2   :  { %v1567_v24 = vpop.f32.mrf.mxu0  ;;  %2704 = vmatprep.subr.bf16.mxu0 %v3131_v14 }
 0x1c3   :  { %v1568_v46 = vadd.f32 %v1567_v24, %v1525_v39 }
 0x1c4   :  { %v1569_v28 = vpop.f32.mrf.mxu0 }
 0x1c5   :  { %v1570_v21 = vadd.f32 %v1569_v28, %v1527_v45  ;;  %2705 = vmatpush3.bf16.msra.mxu0 %v3132_v15 }
 0x1c6   :  { %v1571_v34 = vpop.f32.mrf.mxu0  ;;  %2706 = vmatprep.subr.bf16.mxu0 %v3133_v16 }
 0x1c7   :  { %v1572_v26 = vadd.f32 %v1571_v34, %v1529_v41 }
 0x1c8   :  { %v1573_v13 = vpop.f32.mrf.mxu0 }
 0x1c9   :  { %v1574_v48 = vadd.f32 %v1573_v13, %v1531_v54  ;;  %2707 = vmatpush3.bf16.msra.mxu0 %v3134_v17 }
 0x1ca   :  { %2708 = vmatprep.subr.bf16.mxu0 %v3135_v18 }
 0x1cb   :  { %v1610_v29 = vpop.f32.mrf.mxu1 }
 0x1cc   :  { %v1611_v49 = vadd.f32 %v1610_v29, %v1568_v46  ;;  %v1763_v29 = vrot.slane %v1758_v27, %v316_v38 }
 0x1cd   :  { %v1612_v31 = vpop.f32.mrf.mxu1  ;;  %2709 = vmatpush3.bf16.msra.mxu0 %v3136_v19 }
 0x1ce   :  { %v1613_v23 = vadd.f32 %v1612_v31, %v1570_v21  ;;  %2710 = vmatprep.subr.bf16.mxu0 %v3137_v20  ;;  %v1767_v31 = vrot.slane %v1758_v27, %v320_v42 }
 0x1cf   :  { %v1614_v35 = vpop.f32.mrf.mxu1 }
 0x1d0   :  { %v1615_v12 = vadd.f32 %v1614_v35, %v1572_v26 }
 0x1d1   :  { %v1616_v37 = vpop.f32.mrf.mxu1  ;;  %2711 = vmatpush3.bf16.msra.mxu0 %v3138_v22 }
 0x1d2   :  { %v1617_v51 = vadd.f32 %v1616_v37, %v1574_v48 }
 0x1d3   :  { %v1653_v43 = vpop.f32.mrf.mxu1 }
 0x1d4   :  { %v1654_v52 = vadd.f32 %v1653_v43, %v1611_v49 }
 0x1d5   :  { %v1655_v47 = vpop.f32.mrf.mxu1 }
 0x1d6   :  { %v1656_v44 = vadd.f32 %v1655_v47, %v1613_v23 }
 0x1d7   :  { %v1657_v50 = vpop.f32.mrf.mxu1 }
 0x1d8   :  { %v1658_v53 = vadd.f32 %v1657_v50, %v1615_v12 }
 0x1d9   :  { %v1659_v40 = vpop.f32.mrf.mxu1 }
 0x1da   :  { %v1664_v55 = vpack.c.bf16 %v1658_v53, %v1654_v52  ;;  %v1660_v56 = vadd.f32 %v1659_v40, %v1617_v51  ;;  %v2679_v53 = vld [vmem:[%s3442_s6] ss:$0 sm:$0xff]  ;;  %s3313_s6 = smov [#allocation11]  }
 0x1db   :  { %s2397_s9 = sshll.u32 %s3313_s6, 4  ;;  %s2398_s9 = int_to_ptr.vmem [resolvable:$true] %s2397_s9 }
 0x1dc   :  { %v2611_v57 = vmul.bf16 3216621497, %v1664_v55  ;;  %v1665_v58 = vpack.c.bf16 %v1660_v56, %v1656_v44  ;;  %s3271_s10 = scalar_lea.vmem %s2398_s9, 256  ;;  %p3276_p12 = scmp.lt.s32.totalorder %s2398_s9, %s2398_s9 }
 0x1dd   :  { %p3272_p11 = scmp.ne.s32.totalorder %s2398_s9, %s3271_s10  ;;  %p3277_p13 = scmp.lt.s32.totalorder %s3271_s10, %s3271_s10 }
 0x1de   :  { %3147 = vpow.bf16 %v2611_v57  ;;  %v2612_v59 = vmul.bf16 3216621497, %v1665_v58 }
 0x1df   :  { %p3278_p0 = por %p3277_p13, %p3276_p12 }
 0x1e0   :  { %3149 = vpow.bf16 %v2612_v59 }
 0x1e1   :  { %p3279_p1 = pnand %p3278_p0, %p3272_p11 }
 0x1ec   :  { %v3148_v60 = vpop.eup %3147 }
 0x1ed   :  { %v1684_v61 = vadd.bf16 1065369472, %v3148_v60 }
 0x1ee   :  { %v3150_v62 = vpop.eup %3149 }
 0x1ef   :  { %v1685_v63 = vadd.bf16 1065369472, %v3150_v62  ;;  %3151 = vrcp.bf16 %v1684_v61 }
 0x1f1   :  { %3153 = vrcp.bf16 %v1685_v63 }
 0x1fd   :  { %v3152_v0 = vpop.eup %3151 }
 0x1fe   :  { %v1691_v3 = vmul.bf16 1065369472, %v3152_v0 }
 0x1ff   :  { %v3154_v1 = vpop.eup %3153 }
 0x200   :  { %v1693_v2 = vmul.bf16 1065369472, %v3154_v1 }
 0x202   :  { %2165 = vmatprep.mubr.bf16.mxu1 %v1693_v2 }
 0x203   :  { %2166 = vmatmul.mubr.bf16.vlgmr.msra.gmra.mxu1 %v1691_v3 }
 0x274   :  { %v2124_v24 = vpop.f32.mrf.mxu0 }
 0x275   :  { %v2125_v35 = vadd.f32 %v2124_v24, %v1763_v29 }
 0x276   :  { %v2126_v25 = vpop.f32.mrf.mxu0 }
 0x277   :  { %v2127_v39 = vadd.f32 %v2126_v25, %v1767_v31 }
 0x278   :  { %v2128_v28 = vpop.f32.mrf.mxu0 }
 0x279   :  { %v2129_v36 = vadd.f32 %v2128_v28, %v1763_v29 }
 0x27a   :  { %v2130_v32 = vpop.f32.mrf.mxu0 }
 0x27b   :  { %v2131_v41 = vadd.f32 %v2130_v32, %v1767_v31 }
 0x2c3   :  { %v2167_v30 = vpop.f32.mrf.mxu1 }
 0x2c4   :  { %v2168_v13 = vadd.f32 %v2167_v30, %v2125_v35 }
 0x2c5   :  { %v2169_v34 = vpop.f32.mrf.mxu1 }
 0x2c6   :  { %v2170_v54 = vadd.f32 %v2169_v34, %v2127_v39 }
 0x2c7   :  { %v2171_v37 = vpop.f32.mrf.mxu1 }
 0x2c8   :  { %v2172_v43 = vadd.f32 %v2171_v37, %v2129_v36 }
 0x2c9   :  { %v2173_v45 = vpop.f32.mrf.mxu1 }
 0x2ca   :  { %v2176_v46 = vpack.c.bf16 %v2172_v43, %v2168_v13  ;;  %v2174_v26 = vadd.f32 %v2173_v45, %v2131_v41 }
 0x2cc   :  { %v2677_v47 = vmul.bf16 3216621497, %v2176_v46  ;;  %v2177_v21 = vpack.c.bf16 %v2174_v26, %v2170_v54 }
 0x2ce   :  { %3155 = vpow.bf16 %v2677_v47  ;;  %v2678_v38 = vmul.bf16 3216621497, %v2177_v21 }
 0x2d0   :  { %3157 = vpow.bf16 %v2678_v38 }
 0x2dc   :  { %v3156_v33 = vpop.eup %3155 }
 0x2dd   :  { %v2186_v42 = vadd.bf16 1065369472, %v3156_v33 }
 0x2de   :  { %v3158_v48 = vpop.eup %3157 }
 0x2df   :  { %v2187_v49 = vadd.bf16 1065369472, %v3158_v48  ;;  %3159 = vrcp.bf16 %v2186_v42 }
 0x2e1   :  { %3161 = vrcp.bf16 %v2187_v49 }
 0x2ed   :  { %v3160_v12 = vpop.eup %3159 }
 0x2ee   :  { %v2189_v51 = vmul.bf16 1065369472, %v3160_v12 }
 0x2ef   :  { %v3162_v50 = vpop.eup %3161 }
 0x2f0   :  { %v2191_v23 = vmul.bf16 1065369472, %v3162_v50 }
 0x2f2   :  { %2359 = vmatprep.mubr.bf16.mxu0 %v2191_v23 }
 0x2f3   :  { %2360 = vmatmul.mubr.bf16.vlgmr.msra.gmra.mxu0 %v2189_v51 }
 0x3b3   :  { %v2712_v52 = vpop.f32.mrf.mxu0 }
 0x3b5   :  { %v2713_v40 = vpop.f32.mrf.mxu0 }
 0x3b6   :  { %v2714_v44 = vadd.f32 %v2713_v40, %v2712_v52 }
 0x3b7   :  { %v2715_v55 = vpop.f32.mrf.mxu0 }
 0x3b8   :  { %v2362_v56 = vadd.f32 %v2714_v44, %v2679_v53 }
 0x3b9   :  { %v2716_v57 = vpop.f32.mrf.mxu0 }
 0x3ba   :  { %v2717_v58 = vadd.f32 %v2716_v57, %v2715_v55  ;;  %2368 = vmax.xlane.f32.xlu0 %v2362_v56 }
 0x3bc   :  { %v2365_v59 = vadd.f32 %v2717_v58, %v2679_v53 }
 0x3be   :  { %2370 = vmax.xlane.f32.xlu0 %v2365_v59 }
 0x443   :  { %v2369_v60 = vpop.xlane.xlu0 %2368 }
 0x444   :  { %v2372_v61 = vsub.f32 %v2362_v56, %v2369_v60 }
 0x446   :  { %v2374_v62 = vmul.f32 1.442695, %v2372_v61 }
 0x447   :  { %v2371_v63 = vpop.xlane.xlu0 %2370 }
 0x448   :  { %3163 = vpow2.f32 %v2374_v62  ;;  %v2373_v0 = vsub.f32 %v2365_v59, %v2371_v63 }
 0x44a   :  { %v2376_v1 = vmul.f32 1.442695, %v2373_v0 }
 0x44c   :  { %3165 = vpow2.f32 %v2376_v1 }
 0x455   :  { %v3164_v2 = vpop.eup %3163 }
 0x456   :  { %2378 = vadd.xlane.f32.xlu1 %v3164_v2 }
 0x459   :  { %v3166_v3 = vpop.eup %3165 }
 0x45a   :  { %2380 = vadd.xlane.f32.xlu1 %v3166_v3 }
 0x4df   :  { %v2379_v4 = vpop.xlane.xlu1 %2378 }
 0x4e0   :  { %3167 = vlog2.f32 %v2379_v4 }
 0x4e3   :  { %v2381_v5 = vpop.xlane.xlu1 %2380 }
 0x4e4   :  { %3169 = vlog2.f32 %v2381_v5 }
 0x4ed   :  { %v3168_v6 = vpop.eup %3167 }
 0x4ee   :  { %v2383_v7 = vmul.f32 0.6931472, %v3168_v6 }
 0x4f0   :  { %v2386_v8 = vadd.f32 %v2383_v7, %v2369_v60 }
 0x4f1   :  { %v3170_v9 = vpop.eup %3169 }
 0x4f2   :  { %v2385_v10 = vmul.f32 0.6931472, %v3170_v9  ;;  %v2388_v11 = vsub.f32 %v2362_v56, %v2386_v8 }
 0x4f4   :  { %v2387_v14 = vadd.f32 %v2385_v10, %v2371_v63  ;;  %2390 = vst [vmem:[#allocation11] sm:$0xff] %v2388_v11 }
 0x4f6   :  { %v2389_v15 = vsub.f32 %v2365_v59, %v2387_v14 }
 0x4f8   :  { %2391 = vst [vmem:[#allocation11 + $0x8] sm:$0xff] %v2389_v15 }
 0x4f9   :  { %3282 = shalt.err (!%p3279_p1)
}
 0x4fa   :  { %2403 = dma.vmem_to_hbm [thread:$0]  %s2398_s9, 256, %s3443_s7, [#allocation4], %s3303_s11, %s3303_s11, %s3304_s12  }
 0x4fb   :  { %3297 = dma.done.wait [#allocation4], 256  }
 0x4fc   :  { %3298 = vsyncadd [#allocation4], 4294967040 }
 0x4fd   :  { %2407 = vsyncpa [#allocation3], 1 }
 0x4fe   :  { %2408 = vsyncpa [#allocation6], 1 }
 0x4ff   :  { %2409 = vsyncpa [#allocation9], 1 }
 0x500   :  { %2410 = vsyncpa [#allocation4], 1 }

</bundles_post_ra>
